<compile_context>
chip_gen: v7x
topology: tpu7x:2x2x1
jax: 0.10.0
libtpu: 0.0.40
codegen_flags: <defaults>
</compile_context>

<pallas_src>
import functools

import jax
import jax.numpy as jnp
from jax.experimental import pallas as pl


# ----------------------------------------------------------------------------
# Fused forward kernel (no grid: one invocation, everything resident in VMEM)
# ----------------------------------------------------------------------------
def _cnn_rnn_kernel(title_ref, body_ref,
                    w_in_t_ref, b_in_t_ref,
                    w_in_b_ref, b_in_b_ref,
                    w_comb_t_ref, w_comb_b_ref,
                    wc_ref, bc_ref,
                    out_ref,
                    *, bsz, t_len, b_len, nhidden, chid):
    H = nhidden
    Ch = chid
    G = 4 * H

    # ---- prologue: one fused input projection per field (gates | decoder-x) --
    # title_ref/body_ref arrive time-major flattened: (T*B, I).
    proj_t = (jnp.dot(title_ref[...], w_in_t_ref[...],
                      preferred_element_type=jnp.float32)
              + b_in_t_ref[...]).reshape(t_len, bsz, G + Ch)
    proj_b = (jnp.dot(body_ref[...], w_in_b_ref[...],
                      preferred_element_type=jnp.float32)
              + b_in_b_ref[...]).reshape(b_len, bsz, G + Ch)
    xg_t, xd_t = proj_t[:, :, :G], proj_t[:, :, G:]          # (T,B,4H), (T,B,Ch)
    xg_b, xd_b = proj_b[:, :, :G], proj_b[:, :, G:]

    # Constant lane masks for the single-tanh gate nonlinearity:
    #   sigmoid(x) = 0.5*tanh(x/2) + 0.5 ; the x/2 pre-scale on the i/f/o lanes
    #   is already folded into the weights/bias at prepare time.
    half = jnp.concatenate([jnp.full((1, 3 * H), 0.5, jnp.float32),
                            jnp.ones((1, H), jnp.float32)], axis=1)   # (1,4H)
    offs = jnp.concatenate([jnp.full((1, 3 * H), 0.5, jnp.float32),
                            jnp.zeros((1, H), jnp.float32)], axis=1)  # (1,4H)

    def lstm_dec_pool(xg, xd, w_comb, c0, gate_h0, T):
        """LSTM recurrence fused with decoder + tanh + MaxPool1d(T) as a
        running max.  Gate layout [i, f, o, g]; one fused matmul per step:
        h_t @ [Wh | Wdec_h] -> lanes [0:4H] = next step's gate contribution,
        lanes [4H:4H+Ch] = this step's decoder hidden contribution."""
        c = c0                 # None => zeros (skip the f*c term at t=0)
        gate_h = gate_h0       # None => zeros (skip the h-matmul/add at t=0)
        h = None
        feat = None
        for t in range(T):                                   # fully unrolled
            gates = xg[t] if gate_h is None else xg[t] + gate_h   # (B,4H)
            act = jnp.tanh(gates) * half + offs              # i/f/o->sigmoid, g->tanh
            i_g = act[:, 0 * H:1 * H]
            f_g = act[:, 1 * H:2 * H]
            o_g = act[:, 2 * H:3 * H]
            g_g = act[:, 3 * H:4 * H]
            c = i_g * g_g if c is None else f_g * c + i_g * g_g
            h = o_g * jnp.tanh(c)
            # single MXU op feeding next-step gates AND this step's decoder
            fused = jnp.dot(h, w_comb,
                            preferred_element_type=jnp.float32)     # (B,4H+Ch)
            gate_h = fused[:, :G]
            d = jnp.tanh(fused[:, G:] + xd[t])               # decoder + tanh
            feat = d if feat is None else jnp.maximum(feat, d)  # fused maxpool
        return h, c, feat

    w_comb_t = w_comb_t_ref[...]
    w_comb_b = w_comb_b_ref[...]

    h1, c1, t_feat = lstm_dec_pool(xg_t, xd_t, w_comb_t, None, None, t_len)
    # conditional=True: body LSTM starts from the title's final (h, c); seed the
    # fused-loop carry with h1 projected through the *body* recurrent weights.
    gate_h1 = jnp.dot(h1, w_comb_b, preferred_element_type=jnp.float32)[:, :G]
    _, _, b_feat = lstm_dec_pool(xg_b, xd_b, w_comb_b, c1, gate_h1, b_len)

    # classifier(cat(title_feat, body_feat)) as one matmul, then softmax
    feat = jnp.concatenate([t_feat, b_feat], axis=1)          # (B, 2*Ch)
    logits = (jnp.dot(feat, wc_ref[...], preferred_element_type=jnp.float32)
              + bc_ref[...])                                  # (B, nclass)
    m = jnp.max(logits, axis=-1, keepdims=True)
    e = jnp.exp(logits - m)
    out_ref[...] = e / jnp.sum(e, axis=-1, keepdims=True)


# ----------------------------------------------------------------------------
# One-time weight preprocessing (hoisted out of the forward pass)
# ----------------------------------------------------------------------------
def prepare_params(params):
    H = params["t_w_hh"].shape[1]
    Ch = params["dec_title_w"].shape[0]

    def reorder_gates(w):
        # PyTorch LSTM gate order [i, f, g, o] -> [i, f, o, g] (sigmoids first)
        i, f, g, o = jnp.split(w, 4, axis=0)
        return jnp.concatenate([i, f, o, g], axis=0)

    # Fold the x/2 of sigmoid(x)=0.5*tanh(x/2)+0.5 into the i/f/o gate columns.
    gate_scale = jnp.concatenate([jnp.full((3 * H,), 0.5, jnp.float32),
                                  jnp.ones((H,), jnp.float32)])          # (4H,)

    def field(prefix, dec_w_key, dec_b_key):
        w_ih = reorder_gates(params[f"{prefix}_w_ih"])        # (4H, I)
        w_hh = reorder_gates(params[f"{prefix}_w_hh"])        # (4H, H)
        b = reorder_gates(params[f"{prefix}_b_ih"] + params[f"{prefix}_b_hh"])
        dec_w = params[dec_w_key]                             # (Ch, H+I), cat(h, x)
        dec_b = params[dec_b_key]                             # (Ch,)
        wdh = jnp.transpose(dec_w[:, :H])                     # (H, Ch)
        wdx = jnp.transpose(dec_w[:, H:])                     # (I, Ch)
        wx_g = jnp.transpose(w_ih) * gate_scale[None, :]      # (I, 4H) pre-scaled
        wh_g = jnp.transpose(w_hh) * gate_scale[None, :]      # (H, 4H) pre-scaled
        b_g = b * gate_scale                                  # (4H,)  pre-scaled
        w_in = jnp.concatenate([wx_g, wdx], axis=1)           # (I, 4H+Ch)
        b_in = jnp.concatenate([b_g, dec_b]).reshape(1, -1)   # (1, 4H+Ch)
        w_comb = jnp.concatenate([wh_g, wdh], axis=1)         # (H, 4H+Ch)
        return w_in, b_in, w_comb

    w_in_t, b_in_t, w_comb_t = field("t", "dec_title_w", "dec_title_b")
    w_in_b, b_in_b, w_comb_b = field("b", "dec_body_w", "dec_body_b")

    return dict(
        w_in_t=w_in_t, b_in_t=b_in_t, w_comb_t=w_comb_t,
        w_in_b=w_in_b, b_in_b=b_in_b, w_comb_b=w_comb_b,
        wc=jnp.transpose(params["cls_w"]),                    # (2*Ch, nclass)
        bc=params["cls_b"].reshape(1, -1),
    )


def cnn_rnn_forward(x, prep, *, title_len, body_len, nhidden,
                    classify_hidden, nclass):
    B = x.shape[0]
    ninp = x.shape[-1]
    # Pad batch to a multiple of 8 so state/gate vregs fill all sublanes.
    B_pad = ((B + 7) // 8) * 8
    if B_pad != B:
        x = jnp.pad(x, ((0, B_pad - B), (0, 0), (0, 0)))
    # Title/body split + time-major flatten done in XLA, outside the kernel.
    title = jnp.transpose(x[:, :title_len, :], (1, 0, 2)).reshape(
        title_len * B_pad, ninp)
    body = jnp.transpose(x[:, title_len:, :], (1, 0, 2)).reshape(
        body_len * B_pad, ninp)

    kernel = functools.partial(_cnn_rnn_kernel, bsz=B_pad, t_len=title_len,
                               b_len=body_len, nhidden=nhidden,
                               chid=classify_hidden)
    out = pl.pallas_call(
        kernel,
        out_shape=jax.ShapeDtypeStruct((B_pad, nclass), jnp.float32),
    )(title, body,
      prep["w_in_t"], prep["b_in_t"],
      prep["w_in_b"], prep["b_in_b"],
      prep["w_comb_t"], prep["w_comb_b"],
      prep["wc"], prep["bc"])
    return out[:B]


# ----------------------------------------------------------------------------
# Pure-JAX reference (uses the raw PyTorch-layout params) for correctness
# ----------------------------------------------------------------------------
def _lstm_ref(x, h0, c0, w_ih, w_hh, b_ih, b_hh):
    def step(carry, x_t):
        h, c = carry
        gates = x_t @ w_ih.T + b_ih + h @ w_hh.T + b_hh
        i, f, g, o = jnp.split(gates, 4, axis=-1)
        i, f, o = jax.nn.sigmoid(i), jax.nn.sigmoid(f), jax.nn.sigmoid(o)
        g = jnp.tanh(g)
        c = f * c + i * g
        h = o * jnp.tanh(c)
        return (h, c), h
    (hT, cT), ys = jax.lax.scan(step, (h0, c0), jnp.transpose(x, (1, 0, 2)))
    return jnp.transpose(ys, (1, 0, 2)), hT, cT


def _ref_forward(x, params, *, title_len, nhidden):
    B = x.shape[0]
    title, body = x[:, :title_len, :], x[:, title_len:, :]
    z = jnp.zeros((B, nhidden), jnp.float32)
    t_out, h1, c1 = _lstm_ref(title, z, z, params["t_w_ih"], params["t_w_hh"],
                              params["t_b_ih"], params["t_b_hh"])
    b_out, _, _ = _lstm_ref(body, h1, c1, params["b_w_ih"], params["b_w_hh"],
                            params["b_b_ih"], params["b_b_hh"])
    t_cat = jnp.concatenate([t_out, title], axis=2)
    b_cat = jnp.concatenate([b_out, body], axis=2)
    t_dec = jnp.tanh(t_cat @ params["dec_title_w"].T + params["dec_title_b"])
    b_dec = jnp.tanh(b_cat @ params["dec_body_w"].T + params["dec_body_b"])
    feat = jnp.concatenate([jnp.max(t_dec, axis=1), jnp.max(b_dec, axis=1)],
                           axis=1)
    logits = feat @ params["cls_w"].T + params["cls_b"]
    return jax.nn.softmax(logits, axis=1)


# ----------------------------------------------------------------------------
def init_params(key, *, ninput, nhidden, classify_hidden, nclass):
    H = nhidden
    ks = jax.random.split(key, 14)
    k_lstm = 1.0 / jnp.sqrt(H)

    def u(k, shape, bound):
        return jax.random.uniform(k, shape, jnp.float32, -bound, bound)

    k_dec = 1.0 / jnp.sqrt(H + ninput)
    k_cls = 1.0 / jnp.sqrt(2 * classify_hidden)
    return {
        "t_w_ih": u(ks[0], (4 * H, ninput), k_lstm),
        "t_w_hh": u(ks[1], (4 * H, H), k_lstm),
        "t_b_ih": u(ks[2], (4 * H,), k_lstm),
        "t_b_hh": u(ks[3], (4 * H,), k_lstm),
        "b_w_ih": u(ks[4], (4 * H, ninput), k_lstm),
        "b_w_hh": u(ks[5], (4 * H, H), k_lstm),
        "b_b_ih": u(ks[6], (4 * H,), k_lstm),
        "b_b_hh": u(ks[7], (4 * H,), k_lstm),
        "dec_title_w": u(ks[8], (classify_hidden, H + ninput), k_dec),
        "dec_title_b": u(ks[9], (classify_hidden,), k_dec),
        "dec_body_w": u(ks[10], (classify_hidden, H + ninput), k_dec),
        "dec_body_b": u(ks[11], (classify_hidden,), k_dec),
        "cls_w": u(ks[12], (nclass, 2 * classify_hidden), k_cls),
        "cls_b": u(ks[13], (nclass,), k_cls),
    }


if __name__ == "__main__":
    B = 2
    ninput = 16          # titleninput == bodyninput
    nhidden = 32
    classify_hidden = 32
    nclass = 4
    title_len = 8
    body_len = 8

    key = jax.random.PRNGKey(0)
    k_x, k_p = jax.random.split(key)
    x = jax.random.normal(k_x, (B, title_len + body_len, ninput), jnp.float32)
    params = init_params(k_p, ninput=ninput, nhidden=nhidden,
                         classify_hidden=classify_hidden, nclass=nclass)

    prep = jax.tree_util.tree_map(jax.block_until_ready, prepare_params(params))

    fwd = jax.jit(functools.partial(cnn_rnn_forward, title_len=title_len,
                                    body_len=body_len, nhidden=nhidden,
                                    classify_hidden=classify_hidden,
                                    nclass=nclass))
    out = jax.block_until_ready(fwd(x, prep))

    ref = _ref_forward(x, params, title_len=title_len, nhidden=nhidden)
    assert out.shape == (B, nclass)
    assert jnp.allclose(out, ref, atol=1e-4, rtol=1e-4), (out, ref)
    assert jnp.allclose(jnp.sum(out, axis=1), 1.0, atol=1e-5)

    print("KERNEL_OK")
</pallas_src>

<mosaic_0001>
module attributes {stable_mosaic.version = 11 : i64} {
  func.func @_cnn_rnn_kernel(%arg0: memref<64x16xf32, #tpu.memory_space<vmem>>, %arg1: memref<64x16xf32, #tpu.memory_space<vmem>>, %arg2: memref<16x160xf32, #tpu.memory_space<vmem>>, %arg3: memref<1x160xf32, #tpu.memory_space<vmem>>, %arg4: memref<16x160xf32, #tpu.memory_space<vmem>>, %arg5: memref<1x160xf32, #tpu.memory_space<vmem>>, %arg6: memref<32x160xf32, #tpu.memory_space<vmem>>, %arg7: memref<32x160xf32, #tpu.memory_space<vmem>>, %arg8: memref<64x4xf32, #tpu.memory_space<vmem>>, %arg9: memref<1x4xf32, #tpu.memory_space<vmem>>, %arg10: memref<8x4xf32, #tpu.memory_space<vmem>>) attributes {dimension_semantics = [], scalar_prefetch = 0 : i64, scratch_operands = 0 : i64, tpu.core_type = #tpu.core_type<tc>} {
    %c0 = arith.constant 0 : index
    %c0_0 = arith.constant 0 : index
    %0 = vector.load %arg0[%c0, %c0_0] : memref<64x16xf32, #tpu.memory_space<vmem>>, vector<64x16xf32>
    %c0_1 = arith.constant 0 : index
    %c0_2 = arith.constant 0 : index
    %1 = vector.load %arg2[%c0_1, %c0_2] : memref<16x160xf32, #tpu.memory_space<vmem>>, vector<16x160xf32>
    %cst = arith.constant dense<0.000000e+00> : vector<64x160xf32>
    %2 = tpu.matmul %0, %1, %cst {dimension_numbers = #tpu.dot_dimension_numbers<[1], [0], [0], [1], [0, 0, 1, 1], [], []>} : vector<64x16xf32>, vector<16x160xf32>, vector<64x160xf32> -> vector<64x160xf32>
    %c0_3 = arith.constant 0 : index
    %c0_4 = arith.constant 0 : index
    %3 = vector.load %arg3[%c0_3, %c0_4] : memref<1x160xf32, #tpu.memory_space<vmem>>, vector<1x160xf32>
    %4 = vector.broadcast %3 : vector<1x160xf32> to vector<64x160xf32>
    %5 = arith.addf %2, %4 : vector<64x160xf32>
    %6 = vector.shape_cast %5 : vector<64x160xf32> to vector<8x8x160xf32>
    %c0_5 = arith.constant 0 : index
    %c0_6 = arith.constant 0 : index
    %7 = vector.load %arg1[%c0_5, %c0_6] : memref<64x16xf32, #tpu.memory_space<vmem>>, vector<64x16xf32>
    %c0_7 = arith.constant 0 : index
    %c0_8 = arith.constant 0 : index
    %8 = vector.load %arg4[%c0_7, %c0_8] : memref<16x160xf32, #tpu.memory_space<vmem>>, vector<16x160xf32>
    %cst_9 = arith.constant dense<0.000000e+00> : vector<64x160xf32>
    %9 = tpu.matmul %7, %8, %cst_9 {dimension_numbers = #tpu.dot_dimension_numbers<[1], [0], [0], [1], [0, 0, 1, 1], [], []>} : vector<64x16xf32>, vector<16x160xf32>, vector<64x160xf32> -> vector<64x160xf32>
    %c0_10 = arith.constant 0 : index
    %c0_11 = arith.constant 0 : index
    %10 = vector.load %arg5[%c0_10, %c0_11] : memref<1x160xf32, #tpu.memory_space<vmem>>, vector<1x160xf32>
    %11 = vector.broadcast %10 : vector<1x160xf32> to vector<64x160xf32>
    %12 = arith.addf %9, %11 : vector<64x160xf32>
    %13 = vector.shape_cast %12 : vector<64x160xf32> to vector<8x8x160xf32>
    %14 = vector.extract_strided_slice %6 {offsets = [0, 0, 0], sizes = [8, 8, 128], strides = [1, 1, 1]} : vector<8x8x160xf32> to vector<8x8x128xf32>
    %15 = vector.extract_strided_slice %6 {offsets = [0, 0, 128], sizes = [8, 8, 32], strides = [1, 1, 1]} : vector<8x8x160xf32> to vector<8x8x32xf32>
    %16 = vector.extract_strided_slice %13 {offsets = [0, 0, 0], sizes = [8, 8, 128], strides = [1, 1, 1]} : vector<8x8x160xf32> to vector<8x8x128xf32>
    %17 = vector.extract_strided_slice %13 {offsets = [0, 0, 128], sizes = [8, 8, 32], strides = [1, 1, 1]} : vector<8x8x160xf32> to vector<8x8x32xf32>
    %cst_12 = arith.constant 5.000000e-01 : f32
    %18 = vector.broadcast %cst_12 : f32 to vector<1x96xf32>
    %cst_13 = arith.constant 1.000000e+00 : f32
    %19 = vector.broadcast %cst_13 : f32 to vector<1x32xf32>
    %20 = tpu.concatenate %18, %19 in 1 : vector<1x96xf32>, vector<1x32xf32> -> vector<1x128xf32>
    %cst_14 = arith.constant 5.000000e-01 : f32
    %21 = vector.broadcast %cst_14 : f32 to vector<1x96xf32>
    %cst_15 = arith.constant 0.000000e+00 : f32
    %22 = vector.broadcast %cst_15 : f32 to vector<1x32xf32>
    %23 = tpu.concatenate %21, %22 in 1 : vector<1x96xf32>, vector<1x32xf32> -> vector<1x128xf32>
    %c0_16 = arith.constant 0 : index
    %c0_17 = arith.constant 0 : index
    %24 = vector.load %arg6[%c0_16, %c0_17] : memref<32x160xf32, #tpu.memory_space<vmem>>, vector<32x160xf32>
    %c0_18 = arith.constant 0 : index
    %c0_19 = arith.constant 0 : index
    %25 = vector.load %arg7[%c0_18, %c0_19] : memref<32x160xf32, #tpu.memory_space<vmem>>, vector<32x160xf32>
    %26 = vector.extract_strided_slice %14 {offsets = [0, 0, 0], sizes = [1, 8, 128], strides = [1, 1, 1]} : vector<8x8x128xf32> to vector<1x8x128xf32>
    %27 = vector.shape_cast %26 : vector<1x8x128xf32> to vector<8x128xf32>
    %28 = math.tanh %27 : vector<8x128xf32>
    %29 = vector.broadcast %20 : vector<1x128xf32> to vector<8x128xf32>
    %30 = arith.mulf %28, %29 : vector<8x128xf32>
    %31 = vector.broadcast %23 : vector<1x128xf32> to vector<8x128xf32>
    %32 = arith.addf %30, %31 : vector<8x128xf32>
    %33 = vector.extract_strided_slice %32 {offsets = [0, 0], sizes = [8, 32], strides = [1, 1]} : vector<8x128xf32> to vector<8x32xf32>
    %34 = vector.extract_strided_slice %32 {offsets = [0, 64], sizes = [8, 32], strides = [1, 1]} : vector<8x128xf32> to vector<8x32xf32>
    %35 = vector.extract_strided_slice %32 {offsets = [0, 96], sizes = [8, 32], strides = [1, 1]} : vector<8x128xf32> to vector<8x32xf32>
    %36 = arith.mulf %33, %35 : vector<8x32xf32>
    %37 = math.tanh %36 : vector<8x32xf32>
    %38 = arith.mulf %34, %37 : vector<8x32xf32>
    %cst_20 = arith.constant dense<0.000000e+00> : vector<8x160xf32>
    %39 = tpu.matmul %38, %24, %cst_20 {dimension_numbers = #tpu.dot_dimension_numbers<[1], [0], [0], [1], [0, 0, 1, 1], [], []>} : vector<8x32xf32>, vector<32x160xf32>, vector<8x160xf32> -> vector<8x160xf32>
    %40 = vector.extract_strided_slice %39 {offsets = [0, 0], sizes = [8, 128], strides = [1, 1]} : vector<8x160xf32> to vector<8x128xf32>
    %41 = vector.extract_strided_slice %39 {offsets = [0, 128], sizes = [8, 32], strides = [1, 1]} : vector<8x160xf32> to vector<8x32xf32>
    %42 = vector.extract_strided_slice %15 {offsets = [0, 0, 0], sizes = [1, 8, 32], strides = [1, 1, 1]} : vector<8x8x32xf32> to vector<1x8x32xf32>
    %43 = vector.shape_cast %42 : vector<1x8x32xf32> to vector<8x32xf32>
    %44 = arith.addf %41, %43 : vector<8x32xf32>
    %45 = math.tanh %44 : vector<8x32xf32>
    %46 = vector.extract_strided_slice %14 {offsets = [1, 0, 0], sizes = [1, 8, 128], strides = [1, 1, 1]} : vector<8x8x128xf32> to vector<1x8x128xf32>
    %47 = vector.shape_cast %46 : vector<1x8x128xf32> to vector<8x128xf32>
    %48 = arith.addf %47, %40 : vector<8x128xf32>
    %49 = math.tanh %48 : vector<8x128xf32>
    %50 = vector.broadcast %20 : vector<1x128xf32> to vector<8x128xf32>
    %51 = arith.mulf %49, %50 : vector<8x128xf32>
    %52 = vector.broadcast %23 : vector<1x128xf32> to vector<8x128xf32>
    %53 = arith.addf %51, %52 : vector<8x128xf32>
    %54 = vector.extract_strided_slice %53 {offsets = [0, 0], sizes = [8, 32], strides = [1, 1]} : vector<8x128xf32> to vector<8x32xf32>
    %55 = vector.extract_strided_slice %53 {offsets = [0, 32], sizes = [8, 32], strides = [1, 1]} : vector<8x128xf32> to vector<8x32xf32>
    %56 = vector.extract_strided_slice %53 {offsets = [0, 64], sizes = [8, 32], strides = [1, 1]} : vector<8x128xf32> to vector<8x32xf32>
    %57 = vector.extract_strided_slice %53 {offsets = [0, 96], sizes = [8, 32], strides = [1, 1]} : vector<8x128xf32> to vector<8x32xf32>
    %58 = arith.mulf %55, %36 : vector<8x32xf32>
    %59 = arith.mulf %54, %57 : vector<8x32xf32>
    %60 = arith.addf %58, %59 : vector<8x32xf32>
    %61 = math.tanh %60 : vector<8x32xf32>
    %62 = arith.mulf %56, %61 : vector<8x32xf32>
    %cst_21 = arith.constant dense<0.000000e+00> : vector<8x160xf32>
    %63 = tpu.matmul %62, %24, %cst_21 {dimension_numbers = #tpu.dot_dimension_numbers<[1], [0], [0], [1], [0, 0, 1, 1], [], []>} : vector<8x32xf32>, vector<32x160xf32>, vector<8x160xf32> -> vector<8x160xf32>
    %64 = vector.extract_strided_slice %63 {offsets = [0, 0], sizes = [8, 128], strides = [1, 1]} : vector<8x160xf32> to vector<8x128xf32>
    %65 = vector.extract_strided_slice %63 {offsets = [0, 128], sizes = [8, 32], strides = [1, 1]} : vector<8x160xf32> to vector<8x32xf32>
    %66 = vector.extract_strided_slice %15 {offsets = [1, 0, 0], sizes = [1, 8, 32], strides = [1, 1, 1]} : vector<8x8x32xf32> to vector<1x8x32xf32>
    %67 = vector.shape_cast %66 : vector<1x8x32xf32> to vector<8x32xf32>
    %68 = arith.addf %65, %67 : vector<8x32xf32>
    %69 = math.tanh %68 : vector<8x32xf32>
    %70 = arith.maximumf %45, %69 : vector<8x32xf32>
    %71 = vector.extract_strided_slice %14 {offsets = [2, 0, 0], sizes = [1, 8, 128], strides = [1, 1, 1]} : vector<8x8x128xf32> to vector<1x8x128xf32>
    %72 = vector.shape_cast %71 : vector<1x8x128xf32> to vector<8x128xf32>
    %73 = arith.addf %72, %64 : vector<8x128xf32>
    %74 = math.tanh %73 : vector<8x128xf32>
    %75 = vector.broadcast %20 : vector<1x128xf32> to vector<8x128xf32>
    %76 = arith.mulf %74, %75 : vector<8x128xf32>
    %77 = vector.broadcast %23 : vector<1x128xf32> to vector<8x128xf32>
    %78 = arith.addf %76, %77 : vector<8x128xf32>
    %79 = vector.extract_strided_slice %78 {offsets = [0, 0], sizes = [8, 32], strides = [1, 1]} : vector<8x128xf32> to vector<8x32xf32>
    %80 = vector.extract_strided_slice %78 {offsets = [0, 32], sizes = [8, 32], strides = [1, 1]} : vector<8x128xf32> to vector<8x32xf32>
    %81 = vector.extract_strided_slice %78 {offsets = [0, 64], sizes = [8, 32], strides = [1, 1]} : vector<8x128xf32> to vector<8x32xf32>
    %82 = vector.extract_strided_slice %78 {offsets = [0, 96], sizes = [8, 32], strides = [1, 1]} : vector<8x128xf32> to vector<8x32xf32>
    %83 = arith.mulf %80, %60 : vector<8x32xf32>
    %84 = arith.mulf %79, %82 : vector<8x32xf32>
    %85 = arith.addf %83, %84 : vector<8x32xf32>
    %86 = math.tanh %85 : vector<8x32xf32>
    %87 = arith.mulf %81, %86 : vector<8x32xf32>
    %cst_22 = arith.constant dense<0.000000e+00> : vector<8x160xf32>
    %88 = tpu.matmul %87, %24, %cst_22 {dimension_numbers = #tpu.dot_dimension_numbers<[1], [0], [0], [1], [0, 0, 1, 1], [], []>} : vector<8x32xf32>, vector<32x160xf32>, vector<8x160xf32> -> vector<8x160xf32>
    %89 = vector.extract_strided_slice %88 {offsets = [0, 0], sizes = [8, 128], strides = [1, 1]} : vector<8x160xf32> to vector<8x128xf32>
    %90 = vector.extract_strided_slice %88 {offsets = [0, 128], sizes = [8, 32], strides = [1, 1]} : vector<8x160xf32> to vector<8x32xf32>
    %91 = vector.extract_strided_slice %15 {offsets = [2, 0, 0], sizes = [1, 8, 32], strides = [1, 1, 1]} : vector<8x8x32xf32> to vector<1x8x32xf32>
    %92 = vector.shape_cast %91 : vector<1x8x32xf32> to vector<8x32xf32>
    %93 = arith.addf %90, %92 : vector<8x32xf32>
    %94 = math.tanh %93 : vector<8x32xf32>
    %95 = arith.maximumf %70, %94 : vector<8x32xf32>
    %96 = vector.extract_strided_slice %14 {offsets = [3, 0, 0], sizes = [1, 8, 128], strides = [1, 1, 1]} : vector<8x8x128xf32> to vector<1x8x128xf32>
    %97 = vector.shape_cast %96 : vector<1x8x128xf32> to vector<8x128xf32>
    %98 = arith.addf %97, %89 : vector<8x128xf32>
    %99 = math.tanh %98 : vector<8x128xf32>
    %100 = vector.broadcast %20 : vector<1x128xf32> to vector<8x128xf32>
    %101 = arith.mulf %99, %100 : vector<8x128xf32>
    %102 = vector.broadcast %23 : vector<1x128xf32> to vector<8x128xf32>
    %103 = arith.addf %101, %102 : vector<8x128xf32>
    %104 = vector.extract_strided_slice %103 {offsets = [0, 0], sizes = [8, 32], strides = [1, 1]} : vector<8x128xf32> to vector<8x32xf32>
    %105 = vector.extract_strided_slice %103 {offsets = [0, 32], sizes = [8, 32], strides = [1, 1]} : vector<8x128xf32> to vector<8x32xf32>
    %106 = vector.extract_strided_slice %103 {offsets = [0, 64], sizes = [8, 32], strides = [1, 1]} : vector<8x128xf32> to vector<8x32xf32>
    %107 = vector.extract_strided_slice %103 {offsets = [0, 96], sizes = [8, 32], strides = [1, 1]} : vector<8x128xf32> to vector<8x32xf32>
    %108 = arith.mulf %105, %85 : vector<8x32xf32>
    %109 = arith.mulf %104, %107 : vector<8x32xf32>
    %110 = arith.addf %108, %109 : vector<8x32xf32>
    %111 = math.tanh %110 : vector<8x32xf32>
    %112 = arith.mulf %106, %111 : vector<8x32xf32>
    %cst_23 = arith.constant dense<0.000000e+00> : vector<8x160xf32>
    %113 = tpu.matmul %112, %24, %cst_23 {dimension_numbers = #tpu.dot_dimension_numbers<[1], [0], [0], [1], [0, 0, 1, 1], [], []>} : vector<8x32xf32>, vector<32x160xf32>, vector<8x160xf32> -> vector<8x160xf32>
    %114 = vector.extract_strided_slice %113 {offsets = [0, 0], sizes = [8, 128], strides = [1, 1]} : vector<8x160xf32> to vector<8x128xf32>
    %115 = vector.extract_strided_slice %113 {offsets = [0, 128], sizes = [8, 32], strides = [1, 1]} : vector<8x160xf32> to vector<8x32xf32>
    %116 = vector.extract_strided_slice %15 {offsets = [3, 0, 0], sizes = [1, 8, 32], strides = [1, 1, 1]} : vector<8x8x32xf32> to vector<1x8x32xf32>
    %117 = vector.shape_cast %116 : vector<1x8x32xf32> to vector<8x32xf32>
    %118 = arith.addf %115, %117 : vector<8x32xf32>
    %119 = math.tanh %118 : vector<8x32xf32>
    %120 = arith.maximumf %95, %119 : vector<8x32xf32>
    %121 = vector.extract_strided_slice %14 {offsets = [4, 0, 0], sizes = [1, 8, 128], strides = [1, 1, 1]} : vector<8x8x128xf32> to vector<1x8x128xf32>
    %122 = vector.shape_cast %121 : vector<1x8x128xf32> to vector<8x128xf32>
    %123 = arith.addf %122, %114 : vector<8x128xf32>
    %124 = math.tanh %123 : vector<8x128xf32>
    %125 = vector.broadcast %20 : vector<1x128xf32> to vector<8x128xf32>
    %126 = arith.mulf %124, %125 : vector<8x128xf32>
    %127 = vector.broadcast %23 : vector<1x128xf32> to vector<8x128xf32>
    %128 = arith.addf %126, %127 : vector<8x128xf32>
    %129 = vector.extract_strided_slice %128 {offsets = [0, 0], sizes = [8, 32], strides = [1, 1]} : vector<8x128xf32> to vector<8x32xf32>
    %130 = vector.extract_strided_slice %128 {offsets = [0, 32], sizes = [8, 32], strides = [1, 1]} : vector<8x128xf32> to vector<8x32xf32>
    %131 = vector.extract_strided_slice %128 {offsets = [0, 64], sizes = [8, 32], strides = [1, 1]} : vector<8x128xf32> to vector<8x32xf32>
    %132 = vector.extract_strided_slice %128 {offsets = [0, 96], sizes = [8, 32], strides = [1, 1]} : vector<8x128xf32> to vector<8x32xf32>
    %133 = arith.mulf %130, %110 : vector<8x32xf32>
    %134 = arith.mulf %129, %132 : vector<8x32xf32>
    %135 = arith.addf %133, %134 : vector<8x32xf32>
    %136 = math.tanh %135 : vector<8x32xf32>
    %137 = arith.mulf %131, %136 : vector<8x32xf32>
    %cst_24 = arith.constant dense<0.000000e+00> : vector<8x160xf32>
    %138 = tpu.matmul %137, %24, %cst_24 {dimension_numbers = #tpu.dot_dimension_numbers<[1], [0], [0], [1], [0, 0, 1, 1], [], []>} : vector<8x32xf32>, vector<32x160xf32>, vector<8x160xf32> -> vector<8x160xf32>
    %139 = vector.extract_strided_slice %138 {offsets = [0, 0], sizes = [8, 128], strides = [1, 1]} : vector<8x160xf32> to vector<8x128xf32>
    %140 = vector.extract_strided_slice %138 {offsets = [0, 128], sizes = [8, 32], strides = [1, 1]} : vector<8x160xf32> to vector<8x32xf32>
    %141 = vector.extract_strided_slice %15 {offsets = [4, 0, 0], sizes = [1, 8, 32], strides = [1, 1, 1]} : vector<8x8x32xf32> to vector<1x8x32xf32>
    %142 = vector.shape_cast %141 : vector<1x8x32xf32> to vector<8x32xf32>
    %143 = arith.addf %140, %142 : vector<8x32xf32>
    %144 = math.tanh %143 : vector<8x32xf32>
    %145 = arith.maximumf %120, %144 : vector<8x32xf32>
    %146 = vector.extract_strided_slice %14 {offsets = [5, 0, 0], sizes = [1, 8, 128], strides = [1, 1, 1]} : vector<8x8x128xf32> to vector<1x8x128xf32>
    %147 = vector.shape_cast %146 : vector<1x8x128xf32> to vector<8x128xf32>
    %148 = arith.addf %147, %139 : vector<8x128xf32>
    %149 = math.tanh %148 : vector<8x128xf32>
    %150 = vector.broadcast %20 : vector<1x128xf32> to vector<8x128xf32>
    %151 = arith.mulf %149, %150 : vector<8x128xf32>
    %152 = vector.broadcast %23 : vector<1x128xf32> to vector<8x128xf32>
    %153 = arith.addf %151, %152 : vector<8x128xf32>
    %154 = vector.extract_strided_slice %153 {offsets = [0, 0], sizes = [8, 32], strides = [1, 1]} : vector<8x128xf32> to vector<8x32xf32>
    %155 = vector.extract_strided_slice %153 {offsets = [0, 32], sizes = [8, 32], strides = [1, 1]} : vector<8x128xf32> to vector<8x32xf32>
    %156 = vector.extract_strided_slice %153 {offsets = [0, 64], sizes = [8, 32], strides = [1, 1]} : vector<8x128xf32> to vector<8x32xf32>
    %157 = vector.extract_strided_slice %153 {offsets = [0, 96], sizes = [8, 32], strides = [1, 1]} : vector<8x128xf32> to vector<8x32xf32>
    %158 = arith.mulf %155, %135 : vector<8x32xf32>
    %159 = arith.mulf %154, %157 : vector<8x32xf32>
    %160 = arith.addf %158, %159 : vector<8x32xf32>
    %161 = math.tanh %160 : vector<8x32xf32>
    %162 = arith.mulf %156, %161 : vector<8x32xf32>
    %cst_25 = arith.constant dense<0.000000e+00> : vector<8x160xf32>
    %163 = tpu.matmul %162, %24, %cst_25 {dimension_numbers = #tpu.dot_dimension_numbers<[1], [0], [0], [1], [0, 0, 1, 1], [], []>} : vector<8x32xf32>, vector<32x160xf32>, vector<8x160xf32> -> vector<8x160xf32>
    %164 = vector.extract_strided_slice %163 {offsets = [0, 0], sizes = [8, 128], strides = [1, 1]} : vector<8x160xf32> to vector<8x128xf32>
    %165 = vector.extract_strided_slice %163 {offsets = [0, 128], sizes = [8, 32], strides = [1, 1]} : vector<8x160xf32> to vector<8x32xf32>
    %166 = vector.extract_strided_slice %15 {offsets = [5, 0, 0], sizes = [1, 8, 32], strides = [1, 1, 1]} : vector<8x8x32xf32> to vector<1x8x32xf32>
    %167 = vector.shape_cast %166 : vector<1x8x32xf32> to vector<8x32xf32>
    %168 = arith.addf %165, %167 : vector<8x32xf32>
    %169 = math.tanh %168 : vector<8x32xf32>
    %170 = arith.maximumf %145, %169 : vector<8x32xf32>
    %171 = vector.extract_strided_slice %14 {offsets = [6, 0, 0], sizes = [1, 8, 128], strides = [1, 1, 1]} : vector<8x8x128xf32> to vector<1x8x128xf32>
    %172 = vector.shape_cast %171 : vector<1x8x128xf32> to vector<8x128xf32>
    %173 = arith.addf %172, %164 : vector<8x128xf32>
    %174 = math.tanh %173 : vector<8x128xf32>
    %175 = vector.broadcast %20 : vector<1x128xf32> to vector<8x128xf32>
    %176 = arith.mulf %174, %175 : vector<8x128xf32>
    %177 = vector.broadcast %23 : vector<1x128xf32> to vector<8x128xf32>
    %178 = arith.addf %176, %177 : vector<8x128xf32>
    %179 = vector.extract_strided_slice %178 {offsets = [0, 0], sizes = [8, 32], strides = [1, 1]} : vector<8x128xf32> to vector<8x32xf32>
    %180 = vector.extract_strided_slice %178 {offsets = [0, 32], sizes = [8, 32], strides = [1, 1]} : vector<8x128xf32> to vector<8x32xf32>
    %181 = vector.extract_strided_slice %178 {offsets = [0, 64], sizes = [8, 32], strides = [1, 1]} : vector<8x128xf32> to vector<8x32xf32>
    %182 = vector.extract_strided_slice %178 {offsets = [0, 96], sizes = [8, 32], strides = [1, 1]} : vector<8x128xf32> to vector<8x32xf32>
    %183 = arith.mulf %180, %160 : vector<8x32xf32>
    %184 = arith.mulf %179, %182 : vector<8x32xf32>
    %185 = arith.addf %183, %184 : vector<8x32xf32>
    %186 = math.tanh %185 : vector<8x32xf32>
    %187 = arith.mulf %181, %186 : vector<8x32xf32>
    %cst_26 = arith.constant dense<0.000000e+00> : vector<8x160xf32>
    %188 = tpu.matmul %187, %24, %cst_26 {dimension_numbers = #tpu.dot_dimension_numbers<[1], [0], [0], [1], [0, 0, 1, 1], [], []>} : vector<8x32xf32>, vector<32x160xf32>, vector<8x160xf32> -> vector<8x160xf32>
    %189 = vector.extract_strided_slice %188 {offsets = [0, 0], sizes = [8, 128], strides = [1, 1]} : vector<8x160xf32> to vector<8x128xf32>
    %190 = vector.extract_strided_slice %188 {offsets = [0, 128], sizes = [8, 32], strides = [1, 1]} : vector<8x160xf32> to vector<8x32xf32>
    %191 = vector.extract_strided_slice %15 {offsets = [6, 0, 0], sizes = [1, 8, 32], strides = [1, 1, 1]} : vector<8x8x32xf32> to vector<1x8x32xf32>
    %192 = vector.shape_cast %191 : vector<1x8x32xf32> to vector<8x32xf32>
    %193 = arith.addf %190, %192 : vector<8x32xf32>
    %194 = math.tanh %193 : vector<8x32xf32>
    %195 = arith.maximumf %170, %194 : vector<8x32xf32>
    %196 = vector.extract_strided_slice %14 {offsets = [7, 0, 0], sizes = [1, 8, 128], strides = [1, 1, 1]} : vector<8x8x128xf32> to vector<1x8x128xf32>
    %197 = vector.shape_cast %196 : vector<1x8x128xf32> to vector<8x128xf32>
    %198 = arith.addf %197, %189 : vector<8x128xf32>
    %199 = math.tanh %198 : vector<8x128xf32>
    %200 = vector.broadcast %20 : vector<1x128xf32> to vector<8x128xf32>
    %201 = arith.mulf %199, %200 : vector<8x128xf32>
    %202 = vector.broadcast %23 : vector<1x128xf32> to vector<8x128xf32>
    %203 = arith.addf %201, %202 : vector<8x128xf32>
    %204 = vector.extract_strided_slice %203 {offsets = [0, 0], sizes = [8, 32], strides = [1, 1]} : vector<8x128xf32> to vector<8x32xf32>
    %205 = vector.extract_strided_slice %203 {offsets = [0, 32], sizes = [8, 32], strides = [1, 1]} : vector<8x128xf32> to vector<8x32xf32>
    %206 = vector.extract_strided_slice %203 {offsets = [0, 64], sizes = [8, 32], strides = [1, 1]} : vector<8x128xf32> to vector<8x32xf32>
    %207 = vector.extract_strided_slice %203 {offsets = [0, 96], sizes = [8, 32], strides = [1, 1]} : vector<8x128xf32> to vector<8x32xf32>
    %208 = arith.mulf %205, %185 : vector<8x32xf32>
    %209 = arith.mulf %204, %207 : vector<8x32xf32>
    %210 = arith.addf %208, %209 : vector<8x32xf32>
    %211 = math.tanh %210 : vector<8x32xf32>
    %212 = arith.mulf %206, %211 : vector<8x32xf32>
    %cst_27 = arith.constant dense<0.000000e+00> : vector<8x160xf32>
    %213 = tpu.matmul %212, %24, %cst_27 {dimension_numbers = #tpu.dot_dimension_numbers<[1], [0], [0], [1], [0, 0, 1, 1], [], []>} : vector<8x32xf32>, vector<32x160xf32>, vector<8x160xf32> -> vector<8x160xf32>
    %214 = vector.extract_strided_slice %213 {offsets = [0, 128], sizes = [8, 32], strides = [1, 1]} : vector<8x160xf32> to vector<8x32xf32>
    %215 = vector.extract_strided_slice %15 {offsets = [7, 0, 0], sizes = [1, 8, 32], strides = [1, 1, 1]} : vector<8x8x32xf32> to vector<1x8x32xf32>
    %216 = vector.shape_cast %215 : vector<1x8x32xf32> to vector<8x32xf32>
    %217 = arith.addf %214, %216 : vector<8x32xf32>
    %218 = math.tanh %217 : vector<8x32xf32>
    %219 = arith.maximumf %195, %218 : vector<8x32xf32>
    %cst_28 = arith.constant dense<0.000000e+00> : vector<8x160xf32>
    %220 = tpu.matmul %212, %25, %cst_28 {dimension_numbers = #tpu.dot_dimension_numbers<[1], [0], [0], [1], [0, 0, 1, 1], [], []>} : vector<8x32xf32>, vector<32x160xf32>, vector<8x160xf32> -> vector<8x160xf32>
    %221 = vector.extract_strided_slice %220 {offsets = [0, 0], sizes = [8, 128], strides = [1, 1]} : vector<8x160xf32> to vector<8x128xf32>
    %222 = vector.extract_strided_slice %16 {offsets = [0, 0, 0], sizes = [1, 8, 128], strides = [1, 1, 1]} : vector<8x8x128xf32> to vector<1x8x128xf32>
    %223 = vector.shape_cast %222 : vector<1x8x128xf32> to vector<8x128xf32>
    %224 = arith.addf %223, %221 : vector<8x128xf32>
    %225 = math.tanh %224 : vector<8x128xf32>
    %226 = vector.broadcast %20 : vector<1x128xf32> to vector<8x128xf32>
    %227 = arith.mulf %225, %226 : vector<8x128xf32>
    %228 = vector.broadcast %23 : vector<1x128xf32> to vector<8x128xf32>
    %229 = arith.addf %227, %228 : vector<8x128xf32>
    %230 = vector.extract_strided_slice %229 {offsets = [0, 0], sizes = [8, 32], strides = [1, 1]} : vector<8x128xf32> to vector<8x32xf32>
    %231 = vector.extract_strided_slice %229 {offsets = [0, 32], sizes = [8, 32], strides = [1, 1]} : vector<8x128xf32> to vector<8x32xf32>
    %232 = vector.extract_strided_slice %229 {offsets = [0, 64], sizes = [8, 32], strides = [1, 1]} : vector<8x128xf32> to vector<8x32xf32>
    %233 = vector.extract_strided_slice %229 {offsets = [0, 96], sizes = [8, 32], strides = [1, 1]} : vector<8x128xf32> to vector<8x32xf32>
    %234 = arith.mulf %231, %210 : vector<8x32xf32>
    %235 = arith.mulf %230, %233 : vector<8x32xf32>
    %236 = arith.addf %234, %235 : vector<8x32xf32>
    %237 = math.tanh %236 : vector<8x32xf32>
    %238 = arith.mulf %232, %237 : vector<8x32xf32>
    %cst_29 = arith.constant dense<0.000000e+00> : vector<8x160xf32>
    %239 = tpu.matmul %238, %25, %cst_29 {dimension_numbers = #tpu.dot_dimension_numbers<[1], [0], [0], [1], [0, 0, 1, 1], [], []>} : vector<8x32xf32>, vector<32x160xf32>, vector<8x160xf32> -> vector<8x160xf32>
    %240 = vector.extract_strided_slice %239 {offsets = [0, 0], sizes = [8, 128], strides = [1, 1]} : vector<8x160xf32> to vector<8x128xf32>
    %241 = vector.extract_strided_slice %239 {offsets = [0, 128], sizes = [8, 32], strides = [1, 1]} : vector<8x160xf32> to vector<8x32xf32>
    %242 = vector.extract_strided_slice %17 {offsets = [0, 0, 0], sizes = [1, 8, 32], strides = [1, 1, 1]} : vector<8x8x32xf32> to vector<1x8x32xf32>
    %243 = vector.shape_cast %242 : vector<1x8x32xf32> to vector<8x32xf32>
    %244 = arith.addf %241, %243 : vector<8x32xf32>
    %245 = math.tanh %244 : vector<8x32xf32>
    %246 = vector.extract_strided_slice %16 {offsets = [1, 0, 0], sizes = [1, 8, 128], strides = [1, 1, 1]} : vector<8x8x128xf32> to vector<1x8x128xf32>
    %247 = vector.shape_cast %246 : vector<1x8x128xf32> to vector<8x128xf32>
    %248 = arith.addf %247, %240 : vector<8x128xf32>
    %249 = math.tanh %248 : vector<8x128xf32>
    %250 = vector.broadcast %20 : vector<1x128xf32> to vector<8x128xf32>
    %251 = arith.mulf %249, %250 : vector<8x128xf32>
    %252 = vector.broadcast %23 : vector<1x128xf32> to vector<8x128xf32>
    %253 = arith.addf %251, %252 : vector<8x128xf32>
    %254 = vector.extract_strided_slice %253 {offsets = [0, 0], sizes = [8, 32], strides = [1, 1]} : vector<8x128xf32> to vector<8x32xf32>
    %255 = vector.extract_strided_slice %253 {offsets = [0, 32], sizes = [8, 32], strides = [1, 1]} : vector<8x128xf32> to vector<8x32xf32>
    %256 = vector.extract_strided_slice %253 {offsets = [0, 64], sizes = [8, 32], strides = [1, 1]} : vector<8x128xf32> to vector<8x32xf32>
    %257 = vector.extract_strided_slice %253 {offsets = [0, 96], sizes = [8, 32], strides = [1, 1]} : vector<8x128xf32> to vector<8x32xf32>
    %258 = arith.mulf %255, %236 : vector<8x32xf32>
    %259 = arith.mulf %254, %257 : vector<8x32xf32>
    %260 = arith.addf %258, %259 : vector<8x32xf32>
    %261 = math.tanh %260 : vector<8x32xf32>
    %262 = arith.mulf %256, %261 : vector<8x32xf32>
    %cst_30 = arith.constant dense<0.000000e+00> : vector<8x160xf32>
    %263 = tpu.matmul %262, %25, %cst_30 {dimension_numbers = #tpu.dot_dimension_numbers<[1], [0], [0], [1], [0, 0, 1, 1], [], []>} : vector<8x32xf32>, vector<32x160xf32>, vector<8x160xf32> -> vector<8x160xf32>
    %264 = vector.extract_strided_slice %263 {offsets = [0, 0], sizes = [8, 128], strides = [1, 1]} : vector<8x160xf32> to vector<8x128xf32>
    %265 = vector.extract_strided_slice %263 {offsets = [0, 128], sizes = [8, 32], strides = [1, 1]} : vector<8x160xf32> to vector<8x32xf32>
    %266 = vector.extract_strided_slice %17 {offsets = [1, 0, 0], sizes = [1, 8, 32], strides = [1, 1, 1]} : vector<8x8x32xf32> to vector<1x8x32xf32>
    %267 = vector.shape_cast %266 : vector<1x8x32xf32> to vector<8x32xf32>
    %268 = arith.addf %265, %267 : vector<8x32xf32>
    %269 = math.tanh %268 : vector<8x32xf32>
    %270 = arith.maximumf %245, %269 : vector<8x32xf32>
    %271 = vector.extract_strided_slice %16 {offsets = [2, 0, 0], sizes = [1, 8, 128], strides = [1, 1, 1]} : vector<8x8x128xf32> to vector<1x8x128xf32>
    %272 = vector.shape_cast %271 : vector<1x8x128xf32> to vector<8x128xf32>
    %273 = arith.addf %272, %264 : vector<8x128xf32>
    %274 = math.tanh %273 : vector<8x128xf32>
    %275 = vector.broadcast %20 : vector<1x128xf32> to vector<8x128xf32>
    %276 = arith.mulf %274, %275 : vector<8x128xf32>
    %277 = vector.broadcast %23 : vector<1x128xf32> to vector<8x128xf32>
    %278 = arith.addf %276, %277 : vector<8x128xf32>
    %279 = vector.extract_strided_slice %278 {offsets = [0, 0], sizes = [8, 32], strides = [1, 1]} : vector<8x128xf32> to vector<8x32xf32>
    %280 = vector.extract_strided_slice %278 {offsets = [0, 32], sizes = [8, 32], strides = [1, 1]} : vector<8x128xf32> to vector<8x32xf32>
    %281 = vector.extract_strided_slice %278 {offsets = [0, 64], sizes = [8, 32], strides = [1, 1]} : vector<8x128xf32> to vector<8x32xf32>
    %282 = vector.extract_strided_slice %278 {offsets = [0, 96], sizes = [8, 32], strides = [1, 1]} : vector<8x128xf32> to vector<8x32xf32>
    %283 = arith.mulf %280, %260 : vector<8x32xf32>
    %284 = arith.mulf %279, %282 : vector<8x32xf32>
    %285 = arith.addf %283, %284 : vector<8x32xf32>
    %286 = math.tanh %285 : vector<8x32xf32>
    %287 = arith.mulf %281, %286 : vector<8x32xf32>
    %cst_31 = arith.constant dense<0.000000e+00> : vector<8x160xf32>
    %288 = tpu.matmul %287, %25, %cst_31 {dimension_numbers = #tpu.dot_dimension_numbers<[1], [0], [0], [1], [0, 0, 1, 1], [], []>} : vector<8x32xf32>, vector<32x160xf32>, vector<8x160xf32> -> vector<8x160xf32>
    %289 = vector.extract_strided_slice %288 {offsets = [0, 0], sizes = [8, 128], strides = [1, 1]} : vector<8x160xf32> to vector<8x128xf32>
    %290 = vector.extract_strided_slice %288 {offsets = [0, 128], sizes = [8, 32], strides = [1, 1]} : vector<8x160xf32> to vector<8x32xf32>
    %291 = vector.extract_strided_slice %17 {offsets = [2, 0, 0], sizes = [1, 8, 32], strides = [1, 1, 1]} : vector<8x8x32xf32> to vector<1x8x32xf32>
    %292 = vector.shape_cast %291 : vector<1x8x32xf32> to vector<8x32xf32>
    %293 = arith.addf %290, %292 : vector<8x32xf32>
    %294 = math.tanh %293 : vector<8x32xf32>
    %295 = arith.maximumf %270, %294 : vector<8x32xf32>
    %296 = vector.extract_strided_slice %16 {offsets = [3, 0, 0], sizes = [1, 8, 128], strides = [1, 1, 1]} : vector<8x8x128xf32> to vector<1x8x128xf32>
    %297 = vector.shape_cast %296 : vector<1x8x128xf32> to vector<8x128xf32>
    %298 = arith.addf %297, %289 : vector<8x128xf32>
    %299 = math.tanh %298 : vector<8x128xf32>
    %300 = vector.broadcast %20 : vector<1x128xf32> to vector<8x128xf32>
    %301 = arith.mulf %299, %300 : vector<8x128xf32>
    %302 = vector.broadcast %23 : vector<1x128xf32> to vector<8x128xf32>
    %303 = arith.addf %301, %302 : vector<8x128xf32>
    %304 = vector.extract_strided_slice %303 {offsets = [0, 0], sizes = [8, 32], strides = [1, 1]} : vector<8x128xf32> to vector<8x32xf32>
    %305 = vector.extract_strided_slice %303 {offsets = [0, 32], sizes = [8, 32], strides = [1, 1]} : vector<8x128xf32> to vector<8x32xf32>
    %306 = vector.extract_strided_slice %303 {offsets = [0, 64], sizes = [8, 32], strides = [1, 1]} : vector<8x128xf32> to vector<8x32xf32>
    %307 = vector.extract_strided_slice %303 {offsets = [0, 96], sizes = [8, 32], strides = [1, 1]} : vector<8x128xf32> to vector<8x32xf32>
    %308 = arith.mulf %305, %285 : vector<8x32xf32>
    %309 = arith.mulf %304, %307 : vector<8x32xf32>
    %310 = arith.addf %308, %309 : vector<8x32xf32>
    %311 = math.tanh %310 : vector<8x32xf32>
    %312 = arith.mulf %306, %311 : vector<8x32xf32>
    %cst_32 = arith.constant dense<0.000000e+00> : vector<8x160xf32>
    %313 = tpu.matmul %312, %25, %cst_32 {dimension_numbers = #tpu.dot_dimension_numbers<[1], [0], [0], [1], [0, 0, 1, 1], [], []>} : vector<8x32xf32>, vector<32x160xf32>, vector<8x160xf32> -> vector<8x160xf32>
    %314 = vector.extract_strided_slice %313 {offsets = [0, 0], sizes = [8, 128], strides = [1, 1]} : vector<8x160xf32> to vector<8x128xf32>
    %315 = vector.extract_strided_slice %313 {offsets = [0, 128], sizes = [8, 32], strides = [1, 1]} : vector<8x160xf32> to vector<8x32xf32>
    %316 = vector.extract_strided_slice %17 {offsets = [3, 0, 0], sizes = [1, 8, 32], strides = [1, 1, 1]} : vector<8x8x32xf32> to vector<1x8x32xf32>
    %317 = vector.shape_cast %316 : vector<1x8x32xf32> to vector<8x32xf32>
    %318 = arith.addf %315, %317 : vector<8x32xf32>
    %319 = math.tanh %318 : vector<8x32xf32>
    %320 = arith.maximumf %295, %319 : vector<8x32xf32>
    %321 = vector.extract_strided_slice %16 {offsets = [4, 0, 0], sizes = [1, 8, 128], strides = [1, 1, 1]} : vector<8x8x128xf32> to vector<1x8x128xf32>
    %322 = vector.shape_cast %321 : vector<1x8x128xf32> to vector<8x128xf32>
    %323 = arith.addf %322, %314 : vector<8x128xf32>
    %324 = math.tanh %323 : vector<8x128xf32>
    %325 = vector.broadcast %20 : vector<1x128xf32> to vector<8x128xf32>
    %326 = arith.mulf %324, %325 : vector<8x128xf32>
    %327 = vector.broadcast %23 : vector<1x128xf32> to vector<8x128xf32>
    %328 = arith.addf %326, %327 : vector<8x128xf32>
    %329 = vector.extract_strided_slice %328 {offsets = [0, 0], sizes = [8, 32], strides = [1, 1]} : vector<8x128xf32> to vector<8x32xf32>
    %330 = vector.extract_strided_slice %328 {offsets = [0, 32], sizes = [8, 32], strides = [1, 1]} : vector<8x128xf32> to vector<8x32xf32>
    %331 = vector.extract_strided_slice %328 {offsets = [0, 64], sizes = [8, 32], strides = [1, 1]} : vector<8x128xf32> to vector<8x32xf32>
    %332 = vector.extract_strided_slice %328 {offsets = [0, 96], sizes = [8, 32], strides = [1, 1]} : vector<8x128xf32> to vector<8x32xf32>
    %333 = arith.mulf %330, %310 : vector<8x32xf32>
    %334 = arith.mulf %329, %332 : vector<8x32xf32>
    %335 = arith.addf %333, %334 : vector<8x32xf32>
    %336 = math.tanh %335 : vector<8x32xf32>
    %337 = arith.mulf %331, %336 : vector<8x32xf32>
    %cst_33 = arith.constant dense<0.000000e+00> : vector<8x160xf32>
    %338 = tpu.matmul %337, %25, %cst_33 {dimension_numbers = #tpu.dot_dimension_numbers<[1], [0], [0], [1], [0, 0, 1, 1], [], []>} : vector<8x32xf32>, vector<32x160xf32>, vector<8x160xf32> -> vector<8x160xf32>
    %339 = vector.extract_strided_slice %338 {offsets = [0, 0], sizes = [8, 128], strides = [1, 1]} : vector<8x160xf32> to vector<8x128xf32>
    %340 = vector.extract_strided_slice %338 {offsets = [0, 128], sizes = [8, 32], strides = [1, 1]} : vector<8x160xf32> to vector<8x32xf32>
    %341 = vector.extract_strided_slice %17 {offsets = [4, 0, 0], sizes = [1, 8, 32], strides = [1, 1, 1]} : vector<8x8x32xf32> to vector<1x8x32xf32>
    %342 = vector.shape_cast %341 : vector<1x8x32xf32> to vector<8x32xf32>
    %343 = arith.addf %340, %342 : vector<8x32xf32>
    %344 = math.tanh %343 : vector<8x32xf32>
    %345 = arith.maximumf %320, %344 : vector<8x32xf32>
    %346 = vector.extract_strided_slice %16 {offsets = [5, 0, 0], sizes = [1, 8, 128], strides = [1, 1, 1]} : vector<8x8x128xf32> to vector<1x8x128xf32>
    %347 = vector.shape_cast %346 : vector<1x8x128xf32> to vector<8x128xf32>
    %348 = arith.addf %347, %339 : vector<8x128xf32>
    %349 = math.tanh %348 : vector<8x128xf32>
    %350 = vector.broadcast %20 : vector<1x128xf32> to vector<8x128xf32>
    %351 = arith.mulf %349, %350 : vector<8x128xf32>
    %352 = vector.broadcast %23 : vector<1x128xf32> to vector<8x128xf32>
    %353 = arith.addf %351, %352 : vector<8x128xf32>
    %354 = vector.extract_strided_slice %353 {offsets = [0, 0], sizes = [8, 32], strides = [1, 1]} : vector<8x128xf32> to vector<8x32xf32>
    %355 = vector.extract_strided_slice %353 {offsets = [0, 32], sizes = [8, 32], strides = [1, 1]} : vector<8x128xf32> to vector<8x32xf32>
    %356 = vector.extract_strided_slice %353 {offsets = [0, 64], sizes = [8, 32], strides = [1, 1]} : vector<8x128xf32> to vector<8x32xf32>
    %357 = vector.extract_strided_slice %353 {offsets = [0, 96], sizes = [8, 32], strides = [1, 1]} : vector<8x128xf32> to vector<8x32xf32>
    %358 = arith.mulf %355, %335 : vector<8x32xf32>
    %359 = arith.mulf %354, %357 : vector<8x32xf32>
    %360 = arith.addf %358, %359 : vector<8x32xf32>
    %361 = math.tanh %360 : vector<8x32xf32>
    %362 = arith.mulf %356, %361 : vector<8x32xf32>
    %cst_34 = arith.constant dense<0.000000e+00> : vector<8x160xf32>
    %363 = tpu.matmul %362, %25, %cst_34 {dimension_numbers = #tpu.dot_dimension_numbers<[1], [0], [0], [1], [0, 0, 1, 1], [], []>} : vector<8x32xf32>, vector<32x160xf32>, vector<8x160xf32> -> vector<8x160xf32>
    %364 = vector.extract_strided_slice %363 {offsets = [0, 0], sizes = [8, 128], strides = [1, 1]} : vector<8x160xf32> to vector<8x128xf32>
    %365 = vector.extract_strided_slice %363 {offsets = [0, 128], sizes = [8, 32], strides = [1, 1]} : vector<8x160xf32> to vector<8x32xf32>
    %366 = vector.extract_strided_slice %17 {offsets = [5, 0, 0], sizes = [1, 8, 32], strides = [1, 1, 1]} : vector<8x8x32xf32> to vector<1x8x32xf32>
    %367 = vector.shape_cast %366 : vector<1x8x32xf32> to vector<8x32xf32>
    %368 = arith.addf %365, %367 : vector<8x32xf32>
    %369 = math.tanh %368 : vector<8x32xf32>
    %370 = arith.maximumf %345, %369 : vector<8x32xf32>
    %371 = vector.extract_strided_slice %16 {offsets = [6, 0, 0], sizes = [1, 8, 128], strides = [1, 1, 1]} : vector<8x8x128xf32> to vector<1x8x128xf32>
    %372 = vector.shape_cast %371 : vector<1x8x128xf32> to vector<8x128xf32>
    %373 = arith.addf %372, %364 : vector<8x128xf32>
    %374 = math.tanh %373 : vector<8x128xf32>
    %375 = vector.broadcast %20 : vector<1x128xf32> to vector<8x128xf32>
    %376 = arith.mulf %374, %375 : vector<8x128xf32>
    %377 = vector.broadcast %23 : vector<1x128xf32> to vector<8x128xf32>
    %378 = arith.addf %376, %377 : vector<8x128xf32>
    %379 = vector.extract_strided_slice %378 {offsets = [0, 0], sizes = [8, 32], strides = [1, 1]} : vector<8x128xf32> to vector<8x32xf32>
    %380 = vector.extract_strided_slice %378 {offsets = [0, 32], sizes = [8, 32], strides = [1, 1]} : vector<8x128xf32> to vector<8x32xf32>
    %381 = vector.extract_strided_slice %378 {offsets = [0, 64], sizes = [8, 32], strides = [1, 1]} : vector<8x128xf32> to vector<8x32xf32>
    %382 = vector.extract_strided_slice %378 {offsets = [0, 96], sizes = [8, 32], strides = [1, 1]} : vector<8x128xf32> to vector<8x32xf32>
    %383 = arith.mulf %380, %360 : vector<8x32xf32>
    %384 = arith.mulf %379, %382 : vector<8x32xf32>
    %385 = arith.addf %383, %384 : vector<8x32xf32>
    %386 = math.tanh %385 : vector<8x32xf32>
    %387 = arith.mulf %381, %386 : vector<8x32xf32>
    %cst_35 = arith.constant dense<0.000000e+00> : vector<8x160xf32>
    %388 = tpu.matmul %387, %25, %cst_35 {dimension_numbers = #tpu.dot_dimension_numbers<[1], [0], [0], [1], [0, 0, 1, 1], [], []>} : vector<8x32xf32>, vector<32x160xf32>, vector<8x160xf32> -> vector<8x160xf32>
    %389 = vector.extract_strided_slice %388 {offsets = [0, 0], sizes = [8, 128], strides = [1, 1]} : vector<8x160xf32> to vector<8x128xf32>
    %390 = vector.extract_strided_slice %388 {offsets = [0, 128], sizes = [8, 32], strides = [1, 1]} : vector<8x160xf32> to vector<8x32xf32>
    %391 = vector.extract_strided_slice %17 {offsets = [6, 0, 0], sizes = [1, 8, 32], strides = [1, 1, 1]} : vector<8x8x32xf32> to vector<1x8x32xf32>
    %392 = vector.shape_cast %391 : vector<1x8x32xf32> to vector<8x32xf32>
    %393 = arith.addf %390, %392 : vector<8x32xf32>
    %394 = math.tanh %393 : vector<8x32xf32>
    %395 = arith.maximumf %370, %394 : vector<8x32xf32>
    %396 = vector.extract_strided_slice %16 {offsets = [7, 0, 0], sizes = [1, 8, 128], strides = [1, 1, 1]} : vector<8x8x128xf32> to vector<1x8x128xf32>
    %397 = vector.shape_cast %396 : vector<1x8x128xf32> to vector<8x128xf32>
    %398 = arith.addf %397, %389 : vector<8x128xf32>
    %399 = math.tanh %398 : vector<8x128xf32>
    %400 = vector.broadcast %20 : vector<1x128xf32> to vector<8x128xf32>
    %401 = arith.mulf %399, %400 : vector<8x128xf32>
    %402 = vector.broadcast %23 : vector<1x128xf32> to vector<8x128xf32>
    %403 = arith.addf %401, %402 : vector<8x128xf32>
    %404 = vector.extract_strided_slice %403 {offsets = [0, 0], sizes = [8, 32], strides = [1, 1]} : vector<8x128xf32> to vector<8x32xf32>
    %405 = vector.extract_strided_slice %403 {offsets = [0, 32], sizes = [8, 32], strides = [1, 1]} : vector<8x128xf32> to vector<8x32xf32>
    %406 = vector.extract_strided_slice %403 {offsets = [0, 64], sizes = [8, 32], strides = [1, 1]} : vector<8x128xf32> to vector<8x32xf32>
    %407 = vector.extract_strided_slice %403 {offsets = [0, 96], sizes = [8, 32], strides = [1, 1]} : vector<8x128xf32> to vector<8x32xf32>
    %408 = arith.mulf %405, %385 : vector<8x32xf32>
    %409 = arith.mulf %404, %407 : vector<8x32xf32>
    %410 = arith.addf %408, %409 : vector<8x32xf32>
    %411 = math.tanh %410 : vector<8x32xf32>
    %412 = arith.mulf %406, %411 : vector<8x32xf32>
    %cst_36 = arith.constant dense<0.000000e+00> : vector<8x160xf32>
    %413 = tpu.matmul %412, %25, %cst_36 {dimension_numbers = #tpu.dot_dimension_numbers<[1], [0], [0], [1], [0, 0, 1, 1], [], []>} : vector<8x32xf32>, vector<32x160xf32>, vector<8x160xf32> -> vector<8x160xf32>
    %414 = vector.extract_strided_slice %413 {offsets = [0, 128], sizes = [8, 32], strides = [1, 1]} : vector<8x160xf32> to vector<8x32xf32>
    %415 = vector.extract_strided_slice %17 {offsets = [7, 0, 0], sizes = [1, 8, 32], strides = [1, 1, 1]} : vector<8x8x32xf32> to vector<1x8x32xf32>
    %416 = vector.shape_cast %415 : vector<1x8x32xf32> to vector<8x32xf32>
    %417 = arith.addf %414, %416 : vector<8x32xf32>
    %418 = math.tanh %417 : vector<8x32xf32>
    %419 = arith.maximumf %395, %418 : vector<8x32xf32>
    %420 = tpu.concatenate %219, %419 in 1 : vector<8x32xf32>, vector<8x32xf32> -> vector<8x64xf32>
    %c0_37 = arith.constant 0 : index
    %c0_38 = arith.constant 0 : index
    %421 = vector.load %arg8[%c0_37, %c0_38] : memref<64x4xf32, #tpu.memory_space<vmem>>, vector<64x4xf32>
    %cst_39 = arith.constant dense<0.000000e+00> : vector<8x4xf32>
    %422 = tpu.matmul %420, %421, %cst_39 {dimension_numbers = #tpu.dot_dimension_numbers<[1], [0], [0], [1], [0, 0, 1, 1], [], []>} : vector<8x64xf32>, vector<64x4xf32>, vector<8x4xf32> -> vector<8x4xf32>
    %c0_40 = arith.constant 0 : index
    %c0_41 = arith.constant 0 : index
    %423 = vector.load %arg9[%c0_40, %c0_41] : memref<1x4xf32, #tpu.memory_space<vmem>>, vector<1x4xf32>
    %424 = vector.broadcast %423 : vector<1x4xf32> to vector<8x4xf32>
    %425 = arith.addf %422, %424 : vector<8x4xf32>
    %cst_42 = arith.constant dense<0xFF800000> : vector<8xf32>
    %426 = vector.multi_reduction <maximumf>, %425, %cst_42 [1] : vector<8x4xf32> to vector<8xf32>
    %427 = vector.shape_cast %426 : vector<8xf32> to vector<8x1xf32>
    %428 = vector.broadcast %427 : vector<8x1xf32> to vector<8x4xf32>
    %429 = arith.subf %425, %428 : vector<8x4xf32>
    %430 = math.exp %429 : vector<8x4xf32>
    %cst_43 = arith.constant dense<0.000000e+00> : vector<8xf32>
    %431 = vector.multi_reduction <add>, %430, %cst_43 [1] : vector<8x4xf32> to vector<8xf32>
    %432 = vector.shape_cast %431 : vector<8xf32> to vector<8x1xf32>
    %433 = vector.broadcast %432 : vector<8x1xf32> to vector<8x4xf32>
    %434 = arith.divf %430, %433 : vector<8x4xf32>
    %c0_44 = arith.constant 0 : index
    %c0_45 = arith.constant 0 : index
    %435 = vector.load %arg10[%c0_44, %c0_45] : memref<8x4xf32, #tpu.memory_space<vmem>>, vector<8x4xf32>
    tpu.vector_store %arg10[%c0_44, %c0_45], %434 {strides = array<i32>} : memref<8x4xf32, #tpu.memory_space<vmem>>, vector<8x4xf32>,
    return
  }
}

</mosaic_0001>

<bundles_post_ra>
// kernel: cnn_rnn_forward.1
= control target key start
LH: loop header
LB: loop body
LE: loop exit
PB: predicated region body
PF: predicated region fallthrough
CT: control target
= control target key end

     0   :  { %v2485_v3 = vmov 0.0   ;;  %vm59_vm0 = vcmask 130048   ;;  %v49_v8 = vlaneseq  ;;  %vm358_vm1 = vcmask 785408   ;;  %s3116_s2 = inlined_call_operand.vmem [shape: f32[16,160], index: 2, kind: input, shape index: {}]   ;;  %s3117_s0 = inlined_call_operand.vmem [shape: f32[64,16], index: 0, kind: input, shape index: {}]   ;;  %s3118_s3 = inlined_call_operand.vmem [shape: f32[1,160], index: 3, kind: input, shape index: {}]   ;;  %s3119_s6 = inlined_call_operand.vmem [shape: f32[32,160], index: 6, kind: input, shape index: {}]   ;;  %s3120_s4 = inlined_call_operand.vmem [shape: f32[16,160], index: 4, kind: input, shape index: {}]   ;;  %s3121_s1 = inlined_call_operand.vmem [shape: f32[64,16], index: 1, kind: input, shape index: {}]   ;;  %s3122_s5 = inlined_call_operand.vmem [shape: f32[1,160], index: 5, kind: input, shape index: {}]   ;;  %s3123_s7 = inlined_call_operand.vmem [shape: f32[32,160], index: 7, kind: input, shape index: {}]   ;;  %s3124_s8 = inlined_call_operand.vmem [shape: f32[64,4], index: 8, kind: input, shape index: {}]   ;;  %s3125_s9 = inlined_call_operand.vmem [shape: f32[1,4], index: 9, kind: input, shape index: {}]   ;;  %s3126_s10 = inlined_call_operand.vmem [shape: f32[8,4], index: 10, kind: output, shape index: {}]  }
   0x1   :  { %v44_v0 = vld [vmem:[%s3116_s2 + $0x8] sm:$0xff]  ;;  %v46_v1 = vld [vmem:[%s3116_s2 + $0x18] sm:$0xff]  ;;  %v43_v2 = vld [vmem:[%s3116_s2] sm:$0xff]  ;;  %148 = vmatprep.mubr.f32.mxu0 %v2485_v3  ;;  %309 = vmatprep.mubr.f32.mxu1 %v2485_v3  ;;  %v2486_v16 = vmov 1.0   ;;  %v360_v18 = vsel %vm358_vm1, 0.5, %v2485_v3  ;;  %vm402_vm2 = vcmask 261120  }
   0x2   :  { %v2223_v4 = vpack.c.bf16 %v46_v1, %v44_v0  ;;  %v45_v5 = vld [vmem:[%s3116_s2 + $0x10] sm:$0xff]  ;;  %v35_v7 = vld [vmem:[%s3117_s0] sm:$0xff]  ;;  %v2565_v9 = vshrl.u32 %v49_v8, 7  ;;  %v359_v17 = vsel %vm358_vm1, 0.5, %v2486_v16  ;;  %v36_v26 = vld [vmem:[%s3117_s0 + $0x8] sm:$0xff]  ;;  %vm2490_vm3 = vmmov 0  }
   0x3   :  { %v2225_v6 = vpack.c.bf16 %v45_v5, %v43_v2  ;;  %v2573_v11 = vld [vmem:[%s3118_s3] sm:$0x3]  ;;  %s2487_s3 = smov 32   ;;  %v362_v27 = vld [vmem:[%s3119_s6 + $0x8] sm:$0xff]  ;;  %v364_v28 = vld [vmem:[%s3119_s6 + $0x18] sm:$0xff]  ;;  %vm2069_vm4 = vcmask 523264  }
   0x4   :  { %2224 = vmatprep.subr.bf16.mxu0 %v2223_v4  ;;  %v2568_v10 = vsub.s32 0, %v2565_v9  ;;  %v361_v29 = vld [vmem:[%s3119_s6] sm:$0xff]  ;;  %v2605_v30 = vpack.c.bf16 %v364_v28, %v362_v27  ;;  %v363_v31 = vld [vmem:[%s3119_s6 + $0x10] sm:$0xff]  ;;  %v366_v33 = vld [vmem:[%s3119_s6 + $0x28] sm:$0xff]  ;;  %v55_v63 = vsub.s32 1, %v2565_v9  ;;  %vm2143_vm5 = vcmask 31744  }
   0x5   :  { %2226 = vmatpush1.bf16.msra.mxu0 %v2225_v6  ;;  %v37_v32 = vld [vmem:[%s3117_s0 + $0x10] sm:$0xff]  ;;  %v2617_v34 = vpack.c.bf16 %v363_v31, %v361_v29  ;;  %v368_v35 = vld [vmem:[%s3119_s6 + $0x38] sm:$0xff]  ;;  %v365_v36 = vld [vmem:[%s3119_s6 + $0x20] sm:$0xff] }
   0x6   :  { %v2577_v12 = vrot.slane %v2573_v11, %v2568_v10  ;;  %v2584_v19 = vrot.slane %v359_v17, %v2568_v10  ;;  %v2587_v20 = vrot.slane %v360_v18, %v2568_v10  ;;  %v367_v37 = vld [vmem:[%s3119_s6 + $0x30] sm:$0xff]  ;;  %2232 = vmatprep.subr.bf16.mxu0 %v2605_v30  ;;  %v2629_v38 = vpack.c.bf16 %v368_v35, %v366_v33  ;;  %v38_v40 = vld [vmem:[%s3117_s0 + $0x18] sm:$0xff]  ;;  %s2488_s6 = smov 64   ;;  %v39_v42 = vld [vmem:[%s3117_s0 + $0x20] sm:$0xff] }
   0x7   :  { %v2632_v39 = vpack.c.bf16 %v367_v37, %v365_v36  ;;  %v40_v43 = vld [vmem:[%s3117_s0 + $0x28] sm:$0xff]  ;;  %v41_v44 = vld [vmem:[%s3117_s0 + $0x30] sm:$0xff]  ;;  %v42_v45 = vld [vmem:[%s3117_s0 + $0x38] sm:$0xff]  ;;  %v2703_v0 = vrot.slane %v2573_v11, %v55_v63 }
   0x8   :  { %2160 = vmatmul.mubr.msk.f32.vlgmr.msra.gmra.mrb[0].mxu0 %vm59_vm0, %v35_v7  ;;  %v197_v28 = vld [vmem:[%s3121_s1] sm:$0xff]  ;;  %v198_v29 = vld [vmem:[%s3121_s1 + $0x8] sm:$0xff]  ;;  %v200_v33 = vld [vmem:[%s3121_s1 + $0x18] sm:$0xff] }
   0x9   :  { %154 = vmatprep.mubr.f32.mxu0 %v2485_v3  ;;  %2234 = vmatpush1.bf16.msra.mxu0 %v2617_v34  ;;  %v201_v35 = vld [vmem:[%s3121_s1 + $0x20] sm:$0xff]  ;;  %v202_v36 = vld [vmem:[%s3121_s1 + $0x28] sm:$0xff]  ;;  %v203_v37 = vld [vmem:[%s3121_s1 + $0x30] sm:$0xff] }
   0xa   :  { %2236 = vmatprep.subr.bf16.mxu0 %v2629_v38 }
   0xc   :  { %2161 = vmatmul.mubr.msk.f32.gmra.mrb[2].mxu0 %vm59_vm0, %v36_v26  ;;  %v207_v26 = vld [vmem:[%s3120_s4 + $0x10] sm:$0xff] }
   0xd   :  { %160 = vmatprep.mubr.f32.mxu0 %v2485_v3  ;;  %2238 = vmatpush1.bf16.msra.mxu0 %v2632_v39 }
   0xe   :  { %2248 = vmatprep.subr.bf16.mxu0 %v2605_v30 }
  0x10   :  { %2162 = vmatmul.mubr.msk.f32.gmra.mrb[4].mxu0 %vm59_vm0, %v37_v32  ;;  %v199_v32 = vld [vmem:[%s3121_s1 + $0x10] sm:$0xff] }
  0x11   :  { %166 = vmatprep.mubr.f32.mxu0 %v2485_v3 }
  0x14   :  { %2163 = vmatmul.mubr.msk.f32.gmra.mrb[6].mxu0 %vm59_vm0, %v38_v40  ;;  %v204_v40 = vld [vmem:[%s3121_s1 + $0x38] sm:$0xff] }
  0x15   :  { %172 = vmatprep.mubr.f32.mxu0 %v2485_v3 }
  0x18   :  { %2164 = vmatmul.mubr.msk.f32.gmra.mrb[8].mxu0 %vm59_vm0, %v39_v42 }
  0x19   :  { %178 = vmatprep.mubr.f32.mxu0 %v2485_v3 }
  0x1c   :  { %2165 = vmatmul.mubr.msk.f32.gmra.mrb[10].mxu0 %vm59_vm0, %v40_v43  ;;  %v209_v43 = vld [vmem:[%s3122_s5] sm:$0x3] }
  0x1d   :  { %184 = vmatprep.mubr.f32.mxu0 %v2485_v3 }
  0x20   :  { %2166 = vmatmul.mubr.msk.f32.gmra.mrb[12].mxu0 %vm59_vm0, %v41_v44  ;;  %v218_v44 = vrot.slane %v209_v43, %v55_v63 }
  0x21   :  { %190 = vmatprep.mubr.f32.mxu0 %v2485_v3 }
  0x24   :  { %2167 = vmatmul.mubr.msk.f32.gmra.mrb[14].mxu0 %vm59_vm0, %v42_v45 }
  0x25   :  { %469 = vmatprep.mubr.f32.mxu0 %v2485_v3 }
  0xdb   :  { %v150_v13 = vpop.f32.mrb[0].mxu0 }
  0xdc   :  { %v151_v14 = vadd.f32 %v150_v13, %v2577_v12  ;;  %v2580_v15 = vpop.f32.mrb[1].mxu0 }
  0xdd   :  { %v153_v2 = vadd.f32 %v2580_v15, %v2703_v0 }
  0xde   :  { %2385 = vtanh.f32 %v151_v14 }
  0xdf   :  { %v156_v48 = vpop.f32.mrb[2].mxu0 }
  0xe0   :  { %v2667_v49 = vpop.f32.mrb[3].mxu0  ;;  %v157_v1 = vadd.f32 %v156_v48, %v2577_v12  ;;  %v2786_v48 = vrot.slane %v209_v43, %v2568_v10 }
  0xe3   :  { %v2669_v50 = vpop.f32.mrb[4].mxu0 }
  0xe4   :  { %v2671_v51 = vpop.f32.mrb[5].mxu0 }
  0xe7   :  { %v2673_v52 = vpop.f32.mrb[6].mxu0 }
  0xe8   :  { %v2386_v21 = vpop.eup %2385  ;;  %v2675_v53 = vpop.f32.mrb[7].mxu0 }
  0xe9   :  { %v382_v22 = vmul.f32 %v2386_v21, %v2584_v19 }
  0xeb   :  { %v387_v23 = vadd.f32 %v2587_v20, %v382_v22  ;;  %v2677_v54 = vpop.f32.mrb[8].mxu0  ;;  %v206_v22 = vld [vmem:[%s3120_s4 + $0x8] sm:$0xff] }
  0xec   :  { %v2679_v55 = vpop.f32.mrb[9].mxu0 }
  0xed   :  { %389 = vrot.lane.b32.xlu0 %v387_v23, %s2487_s3 }
  0xef   :  { %v2681_v56 = vpop.f32.mrb[10].mxu0 }
  0xf0   :  { %v2683_v57 = vpop.f32.mrb[11].mxu0 }
  0xf3   :  { %v2685_v58 = vpop.f32.mrb[12].mxu0 }
  0xf4   :  { %v2687_v59 = vpop.f32.mrb[13].mxu0 }
  0xf7   :  { %v2689_v60 = vpop.f32.mrb[14].mxu0 }
  0xf8   :  { %v2691_v61 = vpop.f32.mrb[15].mxu0 }
 0x15f   :  { %v390_v24 = vpop.permute.xlu0 %389 }
 0x160   :  { %v392_v25 = vmul.f32 %v390_v24, %v387_v23  ;;  %v205_v24 = vld [vmem:[%s3120_s4] sm:$0xff] }
 0x161   :  { %v2229_v27 = vpack.c.bf16 %v207_v26, %v205_v24 }
 0x162   :  { %2387 = vtanh.f32 %v392_v25 }
 0x16c   :  { %v2388_v41 = vpop.eup %2387 }
 0x16d   :  { %395 = vrot.lane.b32.xlu0 %v2388_v41, %s2488_s6 }
 0x171   :  { %483 = vrot.lane.b32.xlu0 %v392_v25, %s2487_s3 }
 0x1df   :  { %v396_v46 = vpop.permute.xlu0 %395 }
 0x1e0   :  { %v398_v47 = vmul.f32 %v396_v46, %v387_v23  ;;  %v208_v23 = vld [vmem:[%s3120_s4 + $0x18] sm:$0xff] }
 0x1e1   :  { %v2227_v25 = vpack.c.bf16 %v208_v23, %v206_v22 }
 0x1e2   :  { %400 = vrot.lane.b32.xlu1 %v398_v47, %s2488_s6 }
 0x1e3   :  { %v484_v17 = vpop.permute.xlu0 %483  ;;  %2228 = vmatprep.subr.bf16.mxu1 %v2227_v25 }
 0x1e4   :  { %2230 = vmatpush1.bf16.msra.mxu1 %v2229_v27 }
 0x1e5   :  { %2240 = vmatprep.subr.bf16.mxu1 %v2605_v30 }
 0x1e7   :  { %2168 = vmatmul.mubr.msk.f32.vlgmr.msra.gmra.mrb[0].mxu1 %vm59_vm0, %v197_v28 }
 0x1e8   :  { %2242 = vmatpush1.bf16.msra.mxu1 %v2617_v34  ;;  %315 = vmatprep.mubr.f32.mxu1 %v2485_v3 }
 0x1e9   :  { %2244 = vmatprep.subr.bf16.mxu1 %v2629_v38 }
 0x1eb   :  { %2169 = vmatmul.mubr.msk.f32.gmra.mrb[2].mxu1 %vm59_vm0, %v198_v29 }
 0x1ec   :  { %321 = vmatprep.mubr.f32.mxu1 %v2485_v3  ;;  %2246 = vmatpush1.bf16.msra.mxu1 %v2632_v39 }
 0x1ed   :  { %2256 = vmatprep.subr.bf16.mxu1 %v2605_v30 }
 0x1ef   :  { %2170 = vmatmul.mubr.msk.f32.gmra.mrb[4].mxu1 %vm59_vm0, %v199_v32 }
 0x1f0   :  { %327 = vmatprep.mubr.f32.mxu1 %v2485_v3 }
 0x1f3   :  { %2171 = vmatmul.mubr.msk.f32.gmra.mrb[6].mxu1 %vm59_vm0, %v200_v33 }
 0x1f4   :  { %333 = vmatprep.mubr.f32.mxu1 %v2485_v3 }
 0x1f7   :  { %2172 = vmatmul.mubr.msk.f32.gmra.mrb[8].mxu1 %vm59_vm0, %v201_v35 }
 0x1f8   :  { %339 = vmatprep.mubr.f32.mxu1 %v2485_v3 }
 0x1fb   :  { %2173 = vmatmul.mubr.msk.f32.gmra.mrb[10].mxu1 %vm59_vm0, %v202_v36  ;;  %v163_v36 = vadd.f32 %v2669_v50, %v2577_v12 }
 0x1fc   :  { %345 = vmatprep.mubr.f32.mxu1 %v2485_v3 }
 0x1ff   :  { %2174 = vmatmul.mubr.msk.f32.gmra.mrb[12].mxu1 %vm59_vm0, %v203_v37  ;;  %v159_v37 = vadd.f32 %v2667_v49, %v2703_v0 }
 0x200   :  { %351 = vmatprep.mubr.f32.mxu1 %v2485_v3 }
 0x203   :  { %2175 = vmatmul.mubr.msk.f32.gmra.mrb[14].mxu1 %vm59_vm0, %v204_v40 }
 0x204   :  { %572 = vmatprep.mubr.f32.mxu1 %v2485_v3 }
 0x254   :  { %v401_v62 = vpop.permute.xlu1 %400 }
 0x255   :  { %2176 = vmatmul.mubr.msk.f32.vlgmr.msra.gmra.mrb[16].mxu0 %vm402_vm2, %v401_v62 }
 0x256   :  { %2250 = vmatpush1.bf16.msra.mxu0 %v2617_v34  ;;  %672 = vmatprep.mubr.f32.mxu0 %v2485_v3 }
 0x257   :  { %2252 = vmatprep.subr.bf16.mxu0 %v2629_v38 }
 0x25a   :  { %2254 = vmatpush1.bf16.msra.mxu0 %v2632_v39 }
 0x25b   :  { %2264 = vmatprep.subr.bf16.mxu0 %v2605_v30 }
 0x2ba   :  { %v2781_v45 = vpop.f32.mrb[0].mxu1 }
 0x2bb   :  { %v313_v46 = vpop.f32.mrb[1].mxu1 }
 0x2bc   :  { %v2783_v47 = vadd.f32 %v313_v46, %v218_v44 }
 0x2be   :  { %v317_v62 = vpop.f32.mrb[2].mxu1 }
 0x328   :  { %v471_v4 = vpop.f32.mrb[16].mxu0 }
 0x329   :  { %v478_v5 = vadd.f32 %v471_v4, %v157_v1  ;;  %v473_v6 = vpop.f32.mrb[17].mxu0  ;;  %v2789_v1 = vadd.f32 %v317_v62, %v2786_v48 }
 0x32a   :  { %v2708_v7 = vadd.f32 %v473_v6, %v153_v2  ;;  %v319_v2 = vpop.f32.mrb[3].mxu1 }
 0x32b   :  { %2389 = vtanh.f32 %v478_v5  ;;  %v2791_v4 = vadd.f32 %v319_v2, %v218_v44  ;;  %v323_v5 = vpop.f32.mrb[4].mxu1 }
 0x32c   :  { %v2794_v6 = vadd.f32 %v323_v5, %v2786_v48  ;;  %v325_v9 = vpop.f32.mrb[5].mxu1 }
 0x32d   :  { %v2796_v63 = vadd.f32 %v325_v9, %v218_v44 }
 0x335   :  { %v2390_v8 = vpop.eup %2389 }
 0x336   :  { %v480_v13 = vmul.f32 %v2390_v8, %v2584_v19  ;;  %v329_v8 = vpop.f32.mrb[6].mxu1 }
 0x337   :  { %v331_v10 = vpop.f32.mrb[7].mxu1 }
 0x338   :  { %v481_v14 = vadd.f32 %v480_v13, %v2587_v20  ;;  %v2799_v13 = vadd.f32 %v329_v8, %v2786_v48 }
 0x33a   :  { %488 = vrot.lane.b32.xlu1 %v481_v14, %s2487_s3  ;;  %v486_v18 = vmul.f32 %v484_v17, %v481_v14 }
 0x3ac   :  { %v489_v11 = vpop.permute.xlu1 %488 }
 0x3ad   :  { %v491_v16 = vmul.f32 %v489_v11, %v481_v14  ;;  %v335_v11 = vpop.f32.mrb[8].mxu1 }
 0x3ae   :  { %v337_v17 = vpop.f32.mrb[9].mxu1 }
 0x3af   :  { %493 = vrot.lane.b32.xlu1 %v491_v16, %s2487_s3  ;;  %v2804_v16 = vadd.f32 %v335_v11, %v2786_v48 }
 0x421   :  { %v494_v15 = vpop.permute.xlu1 %493 }
 0x422   :  { %v2714_v21 = vadd.f32 %v494_v15, %v486_v18  ;;  %v2806_v18 = vadd.f32 %v337_v17, %v218_v44  ;;  %v341_v15 = vpop.f32.mrb[10].mxu1 }
 0x423   :  { %v2809_v22 = vadd.f32 %v341_v15, %v2786_v48  ;;  %v343_v23 = vpop.f32.mrb[11].mxu1 }
 0x424   :  { %2391 = vtanh.f32 %v2714_v21  ;;  %v2811_v24 = vadd.f32 %v343_v23, %v218_v44  ;;  %v347_v26 = vpop.f32.mrb[12].mxu1 }
 0x425   :  { %v2815_v27 = vadd.f32 %v347_v26, %v2786_v48  ;;  %v349_v28 = vpop.f32.mrb[13].mxu1  ;;  %2393 = vtanh.f32 %v2708_v7 }
 0x426   :  { %v2819_v29 = vadd.f32 %v349_v28, %v218_v44 }
 0x42e   :  { %v2392_v31 = vpop.eup %2391 }
 0x42f   :  { %499 = vrot.lane.b32.xlu0 %v2392_v31, %s2487_s3  ;;  %v353_v31 = vpop.f32.mrb[14].mxu1  ;;  %v2394_v46 = vpop.eup %2393 }
 0x430   :  { %v2823_v32 = vadd.f32 %v353_v31, %v2786_v48  ;;  %v355_v33 = vpop.f32.mrb[15].mxu1 }
 0x431   :  { %v2826_v35 = vadd.f32 %v355_v33, %v218_v44 }
 0x4a1   :  { %v500_v41 = vpop.permute.xlu0 %499 }
 0x4a2   :  { %v502_v42 = vmul.f32 %v500_v41, %v481_v14  ;;  %v2801_v14 = vadd.f32 %v331_v10, %v218_v44 }
 0x4a4   :  { %504 = vrot.lane.b32.xlu1 %v502_v42, %s2488_s6 }
 0x516   :  { %v505_v25 = vpop.permute.xlu1 %504 }
 0x517   :  { %2177 = vmatmul.mubr.msk.f32.vlgmr.msra.gmra.mrb[16].mxu1 %vm402_vm2, %v505_v25  ;;  %v165_v25 = vadd.f32 %v2671_v51, %v2703_v0 }
 0x518   :  { %2258 = vmatpush1.bf16.msra.mxu1 %v2617_v34  ;;  %772 = vmatprep.mubr.f32.mxu1 %v2485_v3 }
 0x519   :  { %2260 = vmatprep.subr.bf16.mxu1 %v2629_v38 }
 0x51c   :  { %2262 = vmatpush1.bf16.msra.mxu1 %v2632_v39 }
 0x51d   :  { %2272 = vmatprep.subr.bf16.mxu1 %v2605_v30 }
 0x5ea   :  { %v574_v40 = vpop.f32.mrb[16].mxu1 }
 0x5eb   :  { %v582_v41 = vadd.f32 %v574_v40, %v163_v36  ;;  %v576_v42 = vpop.f32.mrb[17].mxu1 }
 0x5ec   :  { %v579_v43 = vadd.f32 %v576_v42, %v159_v37 }
 0x5ed   :  { %2395 = vtanh.f32 %v582_v41 }
 0x5ee   :  { %2397 = vtanh.f32 %v579_v43 }
 0x5f7   :  { %v2396_v62 = vpop.eup %2395 }
 0x5f8   :  { %v2398_v44 = vpop.eup %2397  ;;  %v584_v2 = vmul.f32 %v2396_v62, %v2584_v19 }
 0x5f9   :  { %v581_v5 = vmax.f32 %v2394_v46, %v2398_v44 }
 0x5fa   :  { %v585_v9 = vadd.f32 %v584_v2, %v2587_v20 }
 0x5fc   :  { %588 = vrot.lane.b32.xlu0 %v585_v9, %s2487_s3  ;;  %v586_v8 = vmul.f32 %v585_v9, %v2714_v21  ;;  %v169_v21 = vadd.f32 %v2673_v52, %v2577_v12 }
 0x66e   :  { %v589_v50 = vpop.permute.xlu0 %588 }
 0x66f   :  { %v591_v49 = vmul.f32 %v589_v50, %v585_v9  ;;  %v175_v50 = vadd.f32 %v2677_v54, %v2577_v12 }
 0x671   :  { %593 = vrot.lane.b32.xlu1 %v591_v49, %s2487_s3  ;;  %v171_v49 = vadd.f32 %v2675_v53, %v2703_v0 }
 0x6e3   :  { %v594_v7 = vpop.permute.xlu1 %593 }
 0x6e4   :  { %v596_v10 = vadd.f32 %v594_v7, %v586_v8 }
 0x6e6   :  { %2399 = vtanh.f32 %v596_v10 }
 0x6f0   :  { %v2400_v11 = vpop.eup %2399 }
 0x6f1   :  { %599 = vrot.lane.b32.xlu0 %v2400_v11, %s2487_s3 }
 0x763   :  { %v600_v17 = vpop.permute.xlu0 %599 }
 0x764   :  { %v602_v15 = vmul.f32 %v600_v17, %v585_v9 }
 0x766   :  { %604 = vrot.lane.b32.xlu1 %v602_v15, %s2488_s6 }
 0x7d8   :  { %v605_v23 = vpop.permute.xlu1 %604 }
 0x7d9   :  { %2178 = vmatmul.mubr.msk.f32.vlgmr.msra.gmra.mrb[18].mxu0 %vm402_vm2, %v605_v23 }
 0x7da   :  { %2266 = vmatpush1.bf16.msra.mxu0 %v2617_v34  ;;  %872 = vmatprep.mubr.f32.mxu0 %v2485_v3 }
 0x7db   :  { %2268 = vmatprep.subr.bf16.mxu0 %v2629_v38 }
 0x7de   :  { %2270 = vmatpush1.bf16.msra.mxu0 %v2632_v39 }
 0x7df   :  { %2280 = vmatprep.subr.bf16.mxu0 %v2605_v30 }
 0x8ac   :  { %v674_v26 = vpop.f32.mrb[18].mxu0 }
 0x8ad   :  { %v682_v28 = vadd.f32 %v674_v26, %v169_v21  ;;  %v676_v31 = vpop.f32.mrb[19].mxu0 }
 0x8ae   :  { %v679_v33 = vadd.f32 %v676_v31, %v165_v25 }
 0x8af   :  { %2401 = vtanh.f32 %v682_v28 }
 0x8b0   :  { %2403 = vtanh.f32 %v679_v33 }
 0x8b9   :  { %v2402_v36 = vpop.eup %2401 }
 0x8ba   :  { %v2404_v37 = vpop.eup %2403  ;;  %v684_v40 = vmul.f32 %v2402_v36, %v2584_v19 }
 0x8bb   :  { %v2852_v41 = vmax.f32 %v581_v5, %v2404_v37 }
 0x8bc   :  { %v685_v42 = vadd.f32 %v684_v40, %v2587_v20  ;;  %v181_v40 = vadd.f32 %v2681_v56, %v2577_v12 }
 0x8be   :  { %688 = vrot.lane.b32.xlu0 %v685_v42, %s2487_s3  ;;  %v686_v51 = vmul.f32 %v685_v42, %v596_v10 }
 0x930   :  { %v689_v52 = vpop.permute.xlu0 %688 }
 0x931   :  { %v691_v43 = vmul.f32 %v689_v52, %v685_v42 }
 0x933   :  { %693 = vrot.lane.b32.xlu1 %v691_v43, %s2487_s3 }
 0x9a5   :  { %v694_v46 = vpop.permute.xlu1 %693 }
 0x9a6   :  { %v696_v62 = vadd.f32 %v694_v46, %v686_v51 }
 0x9a8   :  { %2405 = vtanh.f32 %v696_v62 }
 0x9b2   :  { %v2406_v44 = vpop.eup %2405 }
 0x9b3   :  { %699 = vrot.lane.b32.xlu0 %v2406_v44, %s2487_s3 }
 0xa25   :  { %v700_v2 = vpop.permute.xlu0 %699 }
 0xa26   :  { %v702_v9 = vmul.f32 %v700_v2, %v685_v42 }
 0xa28   :  { %704 = vrot.lane.b32.xlu1 %v702_v9, %s2488_s6 }
 0xa9a   :  { %v705_v5 = vpop.permute.xlu1 %704 }
 0xa9b   :  { %2179 = vmatmul.mubr.msk.f32.vlgmr.msra.gmra.mrb[18].mxu1 %vm402_vm2, %v705_v5 }
 0xa9c   :  { %2274 = vmatpush1.bf16.msra.mxu1 %v2617_v34  ;;  %972 = vmatprep.mubr.f32.mxu1 %v2485_v3 }
 0xa9d   :  { %2276 = vmatprep.subr.bf16.mxu1 %v2629_v38 }
 0xaa0   :  { %2278 = vmatpush1.bf16.msra.mxu1 %v2632_v39 }
 0xaa1   :  { %2288 = vmatprep.subr.bf16.mxu1 %v2605_v30 }
 0xb6e   :  { %v774_v8 = vpop.f32.mrb[18].mxu1 }
 0xb6f   :  { %v782_v7 = vadd.f32 %v774_v8, %v175_v50  ;;  %v776_v10 = vpop.f32.mrb[19].mxu1 }
 0xb70   :  { %v779_v11 = vadd.f32 %v776_v10, %v171_v49 }
 0xb71   :  { %2407 = vtanh.f32 %v782_v7 }
 0xb72   :  { %2409 = vtanh.f32 %v779_v11 }
 0xb7b   :  { %v2408_v17 = vpop.eup %2407 }
 0xb7c   :  { %v2410_v15 = vpop.eup %2409  ;;  %v784_v23 = vmul.f32 %v2408_v17, %v2584_v19  ;;  %v187_v17 = vadd.f32 %v2685_v58, %v2577_v12 }
 0xb7d   :  { %v781_v21 = vmax.f32 %v2852_v41, %v2410_v15  ;;  %v177_v41 = vadd.f32 %v2679_v55, %v2703_v0  ;;  %v183_v15 = vadd.f32 %v2683_v57, %v2703_v0 }
 0xb7e   :  { %v785_v30 = vadd.f32 %v784_v23, %v2587_v20 }
 0xb80   :  { %788 = vrot.lane.b32.xlu0 %v785_v30, %s2487_s3  ;;  %v786_v53 = vmul.f32 %v785_v30, %v696_v62 }
 0xbf2   :  { %v789_v54 = vpop.permute.xlu0 %788 }
 0xbf3   :  { %v791_v25 = vmul.f32 %v789_v54, %v785_v30 }
 0xbf5   :  { %793 = vrot.lane.b32.xlu1 %v791_v25, %s2487_s3 }
 0xc67   :  { %v794_v26 = vpop.permute.xlu1 %793 }
 0xc68   :  { %v796_v28 = vadd.f32 %v794_v26, %v786_v53 }
 0xc6a   :  { %2411 = vtanh.f32 %v796_v28 }
 0xc74   :  { %v2412_v31 = vpop.eup %2411 }
 0xc75   :  { %799 = vrot.lane.b32.xlu0 %v2412_v31, %s2487_s3 }
 0xce7   :  { %v800_v33 = vpop.permute.xlu0 %799 }
 0xce8   :  { %v802_v36 = vmul.f32 %v800_v33, %v785_v30 }
 0xcea   :  { %804 = vrot.lane.b32.xlu1 %v802_v36, %s2488_s6 }
 0xd5c   :  { %v805_v37 = vpop.permute.xlu1 %804 }
 0xd5d   :  { %2180 = vmatmul.mubr.msk.f32.vlgmr.msra.gmra.mrb[20].mxu0 %vm402_vm2, %v805_v37 }
 0xd5e   :  { %2282 = vmatpush1.bf16.msra.mxu0 %v2617_v34  ;;  %1072 = vmatprep.mubr.f32.mxu0 %v2485_v3 }
 0xd5f   :  { %2284 = vmatprep.subr.bf16.mxu0 %v2629_v38 }
 0xd62   :  { %2286 = vmatpush1.bf16.msra.mxu0 %v2632_v39 }
 0xe30   :  { %v874_v42 = vpop.f32.mrb[20].mxu0 }
 0xe31   :  { %v882_v52 = vadd.f32 %v874_v42, %v181_v40  ;;  %v876_v43 = vpop.f32.mrb[21].mxu0  ;;  %v189_v42 = vadd.f32 %v2687_v59, %v2703_v0 }
 0xe32   :  { %v879_v51 = vadd.f32 %v876_v43, %v177_v41  ;;  %v193_v41 = vadd.f32 %v2689_v60, %v2577_v12 }
 0xe33   :  { %2413 = vtanh.f32 %v882_v52 }
 0xe34   :  { %2415 = vtanh.f32 %v879_v51 }
 0xe3d   :  { %v2414_v46 = vpop.eup %2413 }
 0xe3e   :  { %v2416_v62 = vpop.eup %2415  ;;  %v884_v44 = vmul.f32 %v2414_v46, %v2584_v19 }
 0xe3f   :  { %v881_v2 = vmax.f32 %v781_v21, %v2416_v62 }
 0xe40   :  { %v885_v9 = vadd.f32 %v884_v44, %v2587_v20 }
 0xe42   :  { %888 = vrot.lane.b32.xlu0 %v885_v9, %s2487_s3  ;;  %v886_v55 = vmul.f32 %v885_v9, %v796_v28 }
 0xeb4   :  { %v889_v5 = vpop.permute.xlu0 %888 }
 0xeb5   :  { %v891_v56 = vmul.f32 %v889_v5, %v885_v9 }
 0xeb7   :  { %893 = vrot.lane.b32.xlu1 %v891_v56, %s2487_s3 }
 0xf29   :  { %v894_v50 = vpop.permute.xlu1 %893 }
 0xf2a   :  { %v896_v49 = vadd.f32 %v894_v50, %v886_v55  ;;  %v370_v50 = vld [vmem:[%s3123_s7 + $0x8] sm:$0xff] }
 0xf2c   :  { %2417 = vtanh.f32 %v896_v49 }
 0xf36   :  { %v2418_v8 = vpop.eup %2417 }
 0xf37   :  { %899 = vrot.lane.b32.xlu0 %v2418_v8, %s2487_s3  ;;  %v369_v8 = vld [vmem:[%s3123_s7] sm:$0xff] }
 0xfa9   :  { %v900_v7 = vpop.permute.xlu0 %899 }
 0xfaa   :  { %v902_v10 = vmul.f32 %v900_v7, %v885_v9 }
 0xfac   :  { %904 = vrot.lane.b32.xlu1 %v902_v10, %s2488_s6  ;;  %v371_v10 = vld [vmem:[%s3123_s7 + $0x10] sm:$0xff] }
0x101e   :  { %v905_v11 = vpop.permute.xlu1 %904 }
0x101f   :  { %2181 = vmatmul.mubr.msk.f32.vlgmr.msra.gmra.mrb[20].mxu1 %vm402_vm2, %v905_v11  ;;  %v374_v11 = vld [vmem:[%s3123_s7 + $0x28] sm:$0xff] }
0x1020   :  { %2290 = vmatpush1.bf16.msra.mxu1 %v2617_v34  ;;  %1172 = vmatprep.mubr.f32.mxu1 %v2485_v3 }
0x1021   :  { %2292 = vmatprep.subr.bf16.mxu1 %v2629_v38 }
0x1024   :  { %2294 = vmatpush1.bf16.msra.mxu1 %v2632_v39 }
0x10f2   :  { %v974_v23 = vpop.f32.mrb[20].mxu1 }
0x10f3   :  { %v982_v21 = vadd.f32 %v974_v23, %v187_v17  ;;  %v976_v30 = vpop.f32.mrb[21].mxu1  ;;  %v376_v17 = vld [vmem:[%s3123_s7 + $0x38] sm:$0xff] }
0x10f4   :  { %v979_v54 = vadd.f32 %v976_v30, %v183_v15  ;;  %v2938_v15 = vpack.c.bf16 %v371_v10, %v369_v8  ;;  %v2940_v23 = vpack.c.bf16 %v376_v17, %v374_v11  ;;  %v375_v30 = vld [vmem:[%s3123_s7 + $0x30] sm:$0xff] }
0x10f5   :  { %2419 = vtanh.f32 %v982_v21  ;;  %v373_v21 = vld [vmem:[%s3123_s7 + $0x20] sm:$0xff] }
0x10f6   :  { %2421 = vtanh.f32 %v979_v54  ;;  %v2951_v54 = vpack.c.bf16 %v375_v30, %v373_v21 }
0x10ff   :  { %v2420_v25 = vpop.eup %2419 }
0x1100   :  { %v2422_v34 = vpop.eup %2421  ;;  %v984_v53 = vmul.f32 %v2420_v25, %v2584_v19 }
0x1101   :  { %v981_v26 = vmax.f32 %v881_v2, %v2422_v34 }
0x1102   :  { %v985_v38 = vadd.f32 %v984_v53, %v2587_v20 }
0x1104   :  { %988 = vrot.lane.b32.xlu0 %v985_v38, %s2487_s3  ;;  %v986_v57 = vmul.f32 %v985_v38, %v896_v49  ;;  %v372_v49 = vld [vmem:[%s3123_s7 + $0x18] sm:$0xff] }
0x1105   :  { %v2927_v7 = vpack.c.bf16 %v372_v49, %v370_v50 }
0x1107   :  { %2296 = vmatprep.subr.bf16.mxu0 %v2927_v7  ;;  %2304 = vmatprep.subr.bf16.mxu1 %v2927_v7 }
0x1176   :  { %v989_v39 = vpop.permute.xlu0 %988 }
0x1177   :  { %v991_v58 = vmul.f32 %v989_v39, %v985_v38  ;;  %v195_v39 = vadd.f32 %v2691_v61, %v2703_v0 }
0x1179   :  { %993 = vrot.lane.b32.xlu1 %v991_v58, %s2487_s3 }
0x11eb   :  { %v994_v28 = vpop.permute.xlu1 %993 }
0x11ec   :  { %v996_v31 = vadd.f32 %v994_v28, %v986_v57 }
0x11ee   :  { %2423 = vtanh.f32 %v996_v31 }
0x11f8   :  { %v2424_v33 = vpop.eup %2423 }
0x11f9   :  { %999 = vrot.lane.b32.xlu0 %v2424_v33, %s2487_s3 }
0x126b   :  { %v1000_v36 = vpop.permute.xlu0 %999 }
0x126c   :  { %v1002_v37 = vmul.f32 %v1000_v36, %v985_v38  ;;  %v312_v38 = vadd.f32 %v2781_v45, %v2786_v48 }
0x126e   :  { %1004 = vrot.lane.b32.xlu1 %v1002_v37, %s2488_s6 }
0x12e0   :  { %v1005_v40 = vpop.permute.xlu1 %1004 }
0x12e1   :  { %2182 = vmatmul.mubr.msk.f32.vlgmr.msra.gmra.mrb[22].mxu0 %vm402_vm2, %v1005_v40 }
0x12e2   :  { %1245 = vmatprep.mubr.f32.mxu0 %v2485_v3  ;;  %2298 = vmatpush1.bf16.msra.mxu0 %v2938_v15 }
0x12e3   :  { %2300 = vmatprep.subr.bf16.mxu0 %v2940_v23 }
0x12e6   :  { %2302 = vmatpush1.bf16.msra.mxu0 %v2951_v54 }
0x12e7   :  { %2312 = vmatprep.subr.bf16.mxu0 %v2927_v7 }
0x13b4   :  { %v1074_v52 = vpop.f32.mrb[22].mxu0 }
0x13b5   :  { %v1082_v43 = vadd.f32 %v1074_v52, %v193_v41  ;;  %v1076_v51 = vpop.f32.mrb[23].mxu0 }
0x13b6   :  { %v1079_v46 = vadd.f32 %v1076_v51, %v189_v42 }
0x13b7   :  { %2425 = vtanh.f32 %v1082_v43 }
0x13b8   :  { %2427 = vtanh.f32 %v1079_v46 }
0x13c1   :  { %v2426_v62 = vpop.eup %2425 }
0x13c2   :  { %v2428_v44 = vpop.eup %2427  ;;  %v1084_v2 = vmul.f32 %v2426_v62, %v2584_v19 }
0x13c3   :  { %v2913_v9 = vmax.f32 %v981_v26, %v2428_v44 }
0x13c4   :  { %v1085_v5 = vadd.f32 %v1084_v2, %v2587_v20 }
0x13c6   :  { %1088 = vrot.lane.b32.xlu0 %v1085_v5, %s2487_s3  ;;  %v1086_v59 = vmul.f32 %v1085_v5, %v996_v31 }
0x1438   :  { %v1089_v12 = vpop.permute.xlu0 %1088 }
0x1439   :  { %v1091_v60 = vmul.f32 %v1089_v12, %v1085_v5 }
0x143b   :  { %1093 = vrot.lane.b32.xlu1 %v1091_v60, %s2487_s3 }
0x14ad   :  { %v1094_v56 = vpop.permute.xlu1 %1093 }
0x14ae   :  { %v1096_v55 = vadd.f32 %v1094_v56, %v1086_v59 }
0x14b0   :  { %2429 = vtanh.f32 %v1096_v55 }
0x14ba   :  { %v2430_v25 = vpop.eup %2429 }
0x14bb   :  { %1099 = vrot.lane.b32.xlu0 %v2430_v25, %s2487_s3 }
0x152d   :  { %v1100_v34 = vpop.permute.xlu0 %1099 }
0x152e   :  { %v1102_v53 = vmul.f32 %v1100_v34, %v1085_v5 }
0x1530   :  { %1104 = vrot.lane.b32.xlu1 %v1102_v53, %s2488_s6 }
0x15a2   :  { %v1105_v26 = vpop.permute.xlu1 %1104 }
0x15a3   :  { %2183 = vmatmul.mubr.msk.f32.vlgmr.msra.gmra.mrb[22].mxu1 %vm402_vm2, %v1105_v26  ;;  %2184 = vmatmul.mubr.msk.f32.vlgmr.msra.gmra.mrb[24].mxu0 %vm402_vm2, %v1105_v26 }
0x15a4   :  { %2306 = vmatpush1.bf16.msra.mxu1 %v2938_v15  ;;  %1341 = vmatprep.mubr.f32.mxu1 %v2485_v3 }
0x15a5   :  { %2308 = vmatprep.subr.bf16.mxu1 %v2940_v23  ;;  %2314 = vmatpush1.bf16.msra.mxu0 %v2938_v15 }
0x15a6   :  { %2316 = vmatprep.subr.bf16.mxu0 %v2940_v23  ;;  %1440 = vmatprep.mubr.f32.mxu0 %v2485_v3 }
0x15a8   :  { %2310 = vmatpush1.bf16.msra.mxu1 %v2951_v54 }
0x15a9   :  { %2318 = vmatpush1.bf16.msra.mxu0 %v2951_v54  ;;  %2320 = vmatprep.subr.bf16.mxu1 %v2927_v7 }
0x15aa   :  { %2328 = vmatprep.subr.bf16.mxu0 %v2927_v7 }
0x1676   :  { %v1174_v58 = vpop.f32.mrb[22].mxu1  ;;  %v1247_v57 = vpop.f32.mrb[24].mxu0 }
0x1677   :  { %v1251_v28 = vadd.f32 %v1247_v57, %v312_v38  ;;  %v1175_v31 = vpop.f32.mrb[23].mxu1  ;;  %v1249_v33 = vpop.f32.mrb[25].mxu0 }
0x1678   :  { %v1178_v36 = vadd.f32 %v1175_v31, %v195_v39 }
0x1679   :  { %2431 = vtanh.f32 %v1251_v28 }
0x167a   :  { %2433 = vtanh.f32 %v1178_v36 }
0x1683   :  { %v2432_v37 = vpop.eup %2431 }
0x1684   :  { %v2974_v40 = vpop.eup %2433  ;;  %v1253_v41 = vmul.f32 %v2432_v37, %v2584_v19 }
0x1685   :  { %v1180_v42 = vmax.f32 %v2913_v9, %v2974_v40 }
0x1686   :  { %v1254_v45 = vadd.f32 %v1253_v41, %v2587_v20 }
0x1688   :  { %1257 = vrot.lane.b32.xlu0 %v1254_v45, %s2487_s3  ;;  %v1255_v48 = vmul.f32 %v1254_v45, %v1096_v55 }
0x16fa   :  { %v1258_v61 = vpop.permute.xlu0 %1257 }
0x16fb   :  { %v1260_v0 = vmul.f32 %v1258_v61, %v1254_v45 }
0x16fd   :  { %1262 = vrot.lane.b32.xlu1 %v1260_v0, %s2487_s3 }
0x176f   :  { %v1263_v52 = vpop.permute.xlu1 %1262 }
0x1770   :  { %v1265_v43 = vadd.f32 %v1263_v52, %v1255_v48 }
0x1772   :  { %2435 = vtanh.f32 %v1265_v43 }
0x177c   :  { %v2436_v51 = vpop.eup %2435 }
0x177d   :  { %1268 = vrot.lane.b32.xlu0 %v2436_v51, %s2487_s3 }
0x17ef   :  { %v1269_v46 = vpop.permute.xlu0 %1268 }
0x17f0   :  { %v1271_v62 = vmul.f32 %v1269_v46, %v1254_v45 }
0x17f2   :  { %1273 = vrot.lane.b32.xlu1 %v1271_v62, %s2488_s6 }
0x1864   :  { %v1274_v44 = vpop.permute.xlu1 %1273 }
0x1865   :  { %2185 = vmatmul.mubr.msk.f32.vlgmr.msra.gmra.mrb[24].mxu1 %vm402_vm2, %v1274_v44 }
0x1866   :  { %2322 = vmatpush1.bf16.msra.mxu1 %v2938_v15  ;;  %1540 = vmatprep.mubr.f32.mxu1 %v2485_v3 }
0x1867   :  { %2324 = vmatprep.subr.bf16.mxu1 %v2940_v23 }
0x186a   :  { %2326 = vmatpush1.bf16.msra.mxu1 %v2951_v54 }
0x186b   :  { %2336 = vmatprep.subr.bf16.mxu1 %v2927_v7 }
0x1938   :  { %v1343_v2 = vpop.f32.mrb[24].mxu1 }
0x1939   :  { %v1350_v5 = vadd.f32 %v1343_v2, %v2789_v1  ;;  %v1345_v12 = vpop.f32.mrb[25].mxu1 }
0x193a   :  { %v1348_v60 = vadd.f32 %v1345_v12, %v2783_v47 }
0x193b   :  { %2437 = vtanh.f32 %v1350_v5 }
0x1945   :  { %v2438_v59 = vpop.eup %2437 }
0x1946   :  { %v1352_v56 = vmul.f32 %v2438_v59, %v2584_v19 }
0x1948   :  { %v1353_v55 = vadd.f32 %v1352_v56, %v2587_v20 }
0x194a   :  { %1356 = vrot.lane.b32.xlu0 %v1353_v55, %s2487_s3  ;;  %v1354_v8 = vmul.f32 %v1353_v55, %v1265_v43 }
0x19bc   :  { %v1357_v50 = vpop.permute.xlu0 %1356 }
0x19bd   :  { %v1359_v49 = vmul.f32 %v1357_v50, %v1353_v55 }
0x19bf   :  { %1361 = vrot.lane.b32.xlu1 %v1359_v49, %s2487_s3 }
0x1a31   :  { %v1362_v10 = vpop.permute.xlu1 %1361 }
0x1a32   :  { %v1364_v11 = vadd.f32 %v1362_v10, %v1354_v8 }
0x1a34   :  { %2439 = vtanh.f32 %v1364_v11 }
0x1a35   :  { %2441 = vtanh.f32 %v1348_v60 }
0x1a3e   :  { %v2440_v1 = vpop.eup %2439 }
0x1a3f   :  { %1367 = vrot.lane.b32.xlu0 %v2440_v1, %s2487_s3  ;;  %v2442_v26 = vpop.eup %2441 }
0x1ab1   :  { %v1368_v47 = vpop.permute.xlu0 %1367 }
0x1ab2   :  { %v1370_v17 = vmul.f32 %v1368_v47, %v1353_v55 }
0x1ab4   :  { %1372 = vrot.lane.b32.xlu1 %v1370_v17, %s2488_s6 }
0x1b26   :  { %v1373_v21 = vpop.permute.xlu1 %1372 }
0x1b27   :  { %2186 = vmatmul.mubr.msk.f32.vlgmr.msra.gmra.mrb[26].mxu0 %vm402_vm2, %v1373_v21 }
0x1b28   :  { %2330 = vmatpush1.bf16.msra.mxu0 %v2938_v15  ;;  %1640 = vmatprep.mubr.f32.mxu0 %v2485_v3 }
0x1b29   :  { %2332 = vmatprep.subr.bf16.mxu0 %v2940_v23 }
0x1b2c   :  { %2334 = vmatpush1.bf16.msra.mxu0 %v2951_v54 }
0x1b2d   :  { %2344 = vmatprep.subr.bf16.mxu0 %v2927_v7 }
0x1bfa   :  { %v1442_v30 = vpop.f32.mrb[26].mxu0 }
0x1bfb   :  { %v1450_v25 = vadd.f32 %v1442_v30, %v2794_v6  ;;  %v1444_v34 = vpop.f32.mrb[27].mxu0 }
0x1bfc   :  { %v1447_v53 = vadd.f32 %v1444_v34, %v2791_v4 }
0x1bfd   :  { %2443 = vtanh.f32 %v1450_v25 }
0x1bfe   :  { %2445 = vtanh.f32 %v1447_v53 }
0x1c07   :  { %v2444_v38 = vpop.eup %2443 }
0x1c08   :  { %v2446_v39 = vpop.eup %2445  ;;  %v1452_v58 = vmul.f32 %v2444_v38, %v2584_v19 }
0x1c09   :  { %v1449_v57 = vmax.f32 %v2442_v26, %v2446_v39 }
0x1c0a   :  { %v1453_v28 = vadd.f32 %v1452_v58, %v2587_v20 }
0x1c0c   :  { %1456 = vrot.lane.b32.xlu0 %v1453_v28, %s2487_s3  ;;  %v1454_v6 = vmul.f32 %v1453_v28, %v1364_v11 }
0x1c7e   :  { %v1457_v31 = vpop.permute.xlu0 %1456 }
0x1c7f   :  { %v1459_v33 = vmul.f32 %v1457_v31, %v1453_v28 }
0x1c81   :  { %1461 = vrot.lane.b32.xlu1 %v1459_v33, %s2487_s3 }
0x1cf3   :  { %v1462_v36 = vpop.permute.xlu1 %1461 }
0x1cf4   :  { %v1464_v37 = vadd.f32 %v1462_v36, %v1454_v6 }
0x1cf6   :  { %2447 = vtanh.f32 %v1464_v37 }
0x1d00   :  { %v2448_v4 = vpop.eup %2447 }
0x1d01   :  { %1467 = vrot.lane.b32.xlu0 %v2448_v4, %s2487_s3 }
0x1d73   :  { %v1468_v41 = vpop.permute.xlu0 %1467 }
0x1d74   :  { %v1470_v45 = vmul.f32 %v1468_v41, %v1453_v28 }
0x1d76   :  { %1472 = vrot.lane.b32.xlu1 %v1470_v45, %s2488_s6 }
0x1de8   :  { %v1473_v61 = vpop.permute.xlu1 %1472 }
0x1de9   :  { %2187 = vmatmul.mubr.msk.f32.vlgmr.msra.gmra.mrb[26].mxu1 %vm402_vm2, %v1473_v61 }
0x1dea   :  { %2338 = vmatpush1.bf16.msra.mxu1 %v2938_v15  ;;  %1740 = vmatprep.mubr.f32.mxu1 %v2485_v3 }
0x1deb   :  { %2340 = vmatprep.subr.bf16.mxu1 %v2940_v23 }
0x1dee   :  { %2342 = vmatpush1.bf16.msra.mxu1 %v2951_v54 }
0x1def   :  { %2352 = vmatprep.subr.bf16.mxu1 %v2927_v7 }
0x1ebc   :  { %v1542_v0 = vpop.f32.mrb[26].mxu1 }
0x1ebd   :  { %v1550_v48 = vadd.f32 %v1542_v0, %v2799_v13  ;;  %v1544_v52 = vpop.f32.mrb[27].mxu1 }
0x1ebe   :  { %v1547_v43 = vadd.f32 %v1544_v52, %v2796_v63 }
0x1ebf   :  { %2449 = vtanh.f32 %v1550_v48 }
0x1ec0   :  { %2451 = vtanh.f32 %v1547_v43 }
0x1ec9   :  { %v2450_v51 = vpop.eup %2449 }
0x1eca   :  { %v2452_v46 = vpop.eup %2451  ;;  %v1552_v62 = vmul.f32 %v2450_v51, %v2584_v19 }
0x1ecb   :  { %v1549_v44 = vmax.f32 %v1449_v57, %v2452_v46 }
0x1ecc   :  { %v1553_v2 = vadd.f32 %v1552_v62, %v2587_v20 }
0x1ece   :  { %1556 = vrot.lane.b32.xlu0 %v1553_v2, %s2487_s3  ;;  %v1554_v60 = vmul.f32 %v1553_v2, %v1464_v37 }
0x1f40   :  { %v1557_v5 = vpop.permute.xlu0 %1556 }
0x1f41   :  { %v1559_v12 = vmul.f32 %v1557_v5, %v1553_v2 }
0x1f43   :  { %1561 = vrot.lane.b32.xlu1 %v1559_v12, %s2487_s3 }
0x1fb5   :  { %v1562_v13 = vpop.permute.xlu1 %1561 }
0x1fb6   :  { %v1564_v59 = vadd.f32 %v1562_v13, %v1554_v60 }
0x1fb8   :  { %2453 = vtanh.f32 %v1564_v59 }
0x1fc2   :  { %v2454_v63 = vpop.eup %2453 }
0x1fc3   :  { %1567 = vrot.lane.b32.xlu0 %v2454_v63, %s2487_s3 }
0x2035   :  { %v1568_v56 = vpop.permute.xlu0 %1567 }
0x2036   :  { %v1570_v55 = vmul.f32 %v1568_v56, %v1553_v2 }
0x2038   :  { %1572 = vrot.lane.b32.xlu1 %v1570_v55, %s2488_s6 }
0x20aa   :  { %v1573_v50 = vpop.permute.xlu1 %1572 }
0x20ab   :  { %2188 = vmatmul.mubr.msk.f32.vlgmr.msra.gmra.mrb[28].mxu0 %vm402_vm2, %v1573_v50 }
0x20ac   :  { %2346 = vmatpush1.bf16.msra.mxu0 %v2938_v15  ;;  %1840 = vmatprep.mubr.f32.mxu0 %v2485_v3 }
0x20ad   :  { %2348 = vmatprep.subr.bf16.mxu0 %v2940_v23 }
0x20b0   :  { %2350 = vmatpush1.bf16.msra.mxu0 %v2951_v54 }
0x20b1   :  { %2360 = vmatprep.subr.bf16.mxu0 %v2927_v7 }
0x217e   :  { %v1642_v49 = vpop.f32.mrb[28].mxu0 }
0x217f   :  { %v1650_v8 = vadd.f32 %v1642_v49, %v2804_v16  ;;  %v1644_v10 = vpop.f32.mrb[29].mxu0 }
0x2180   :  { %v1647_v11 = vadd.f32 %v1644_v10, %v2801_v14 }
0x2181   :  { %2455 = vtanh.f32 %v1650_v8 }
0x2182   :  { %2457 = vtanh.f32 %v1647_v11 }
0x218b   :  { %v2456_v1 = vpop.eup %2455 }
0x218c   :  { %v2458_v47 = vpop.eup %2457  ;;  %v1652_v17 = vmul.f32 %v2456_v1, %v2584_v19 }
0x218d   :  { %v1649_v21 = vmax.f32 %v1549_v44, %v2458_v47 }
0x218e   :  { %v1653_v30 = vadd.f32 %v1652_v17, %v2587_v20 }
0x2190   :  { %1656 = vrot.lane.b32.xlu0 %v1653_v30, %s2487_s3  ;;  %v1654_v7 = vmul.f32 %v1653_v30, %v1564_v59 }
0x2202   :  { %v1657_v25 = vpop.permute.xlu0 %1656 }
0x2203   :  { %v1659_v34 = vmul.f32 %v1657_v25, %v1653_v30 }
0x2205   :  { %1661 = vrot.lane.b32.xlu1 %v1659_v34, %s2487_s3 }
0x2277   :  { %v1662_v16 = vpop.permute.xlu1 %1661 }
0x2278   :  { %v1664_v53 = vadd.f32 %v1662_v16, %v1654_v7 }
0x227a   :  { %2459 = vtanh.f32 %v1664_v53 }
0x2284   :  { %v2460_v14 = vpop.eup %2459 }
0x2285   :  { %1667 = vrot.lane.b32.xlu0 %v2460_v14, %s2487_s3  ;;  %v2054_v14 = vld [vmem:[%s3124_s8] sm:$0xff] }
0x22f7   :  { %v1668_v26 = vpop.permute.xlu0 %1667 }
0x22f8   :  { %v1670_v38 = vmul.f32 %v1668_v26, %v1653_v30  ;;  %v2055_v26 = vld [vmem:[%s3124_s8 + $0x8] sm:$0xff] }
0x22fa   :  { %1672 = vrot.lane.b32.xlu1 %v1670_v38, %s2488_s6  ;;  %v2056_v38 = vld [vmem:[%s3124_s8 + $0x10] sm:$0xff] }
0x236c   :  { %v1673_v39 = vpop.permute.xlu1 %1672 }
0x236d   :  { %2189 = vmatmul.mubr.msk.f32.vlgmr.msra.gmra.mrb[28].mxu1 %vm402_vm2, %v1673_v39  ;;  %v2368_v39 = vpack.c.bf16 %v2055_v26, %v2054_v14 }
0x236e   :  { %2354 = vmatpush1.bf16.msra.mxu1 %v2938_v15  ;;  %1940 = vmatprep.mubr.f32.mxu1 %v2485_v3 }
0x236f   :  { %2356 = vmatprep.subr.bf16.mxu1 %v2940_v23 }
0x2372   :  { %2358 = vmatpush1.bf16.msra.mxu1 %v2951_v54 }
0x2440   :  { %v1742_v58 = vpop.f32.mrb[28].mxu1 }
0x2441   :  { %v1750_v57 = vadd.f32 %v1742_v58, %v2809_v22  ;;  %v1744_v28 = vpop.f32.mrb[29].mxu1  ;;  %v2057_v58 = vld [vmem:[%s3124_s8 + $0x18] sm:$0xff] }
0x2442   :  { %v1747_v31 = vadd.f32 %v1744_v28, %v2806_v18  ;;  %v2058_v28 = vld [vmem:[%s3124_s8 + $0x20] sm:$0xff] }
0x2443   :  { %2461 = vtanh.f32 %v1750_v57  ;;  %v2371_v57 = vpack.c.bf16 %v2057_v58, %v2056_v38 }
0x2444   :  { %2463 = vtanh.f32 %v1747_v31  ;;  %v2059_v31 = vld [vmem:[%s3124_s8 + $0x28] sm:$0xff] }
0x244d   :  { %v2462_v33 = vpop.eup %2461 }
0x244e   :  { %v2464_v6 = vpop.eup %2463  ;;  %v1752_v36 = vmul.f32 %v2462_v33, %v2584_v19  ;;  %v2374_v33 = vpack.c.bf16 %v2059_v31, %v2058_v28 }
0x244f   :  { %v1749_v37 = vmax.f32 %v1649_v21, %v2464_v6  ;;  %v2060_v6 = vld [vmem:[%s3124_s8 + $0x30] sm:$0xff] }
0x2450   :  { %v1753_v4 = vadd.f32 %v1752_v36, %v2587_v20  ;;  %v2061_v36 = vld [vmem:[%s3124_s8 + $0x38] sm:$0xff] }
0x2452   :  { %1756 = vrot.lane.b32.xlu0 %v1753_v4, %s2487_s3  ;;  %v1754_v61 = vmul.f32 %v1753_v4, %v1664_v53 }
0x24c4   :  { %v1757_v41 = vpop.permute.xlu0 %1756 }
0x24c5   :  { %v1759_v45 = vmul.f32 %v1757_v41, %v1753_v4 }
0x24c7   :  { %1761 = vrot.lane.b32.xlu1 %v1759_v45, %s2487_s3 }
0x2539   :  { %v1762_v22 = vpop.permute.xlu1 %1761 }
0x253a   :  { %v1764_v0 = vadd.f32 %v1762_v22, %v1754_v61 }
0x253c   :  { %2465 = vtanh.f32 %v1764_v0 }
0x2546   :  { %v2466_v18 = vpop.eup %2465 }
0x2547   :  { %1767 = vrot.lane.b32.xlu0 %v2466_v18, %s2487_s3 }
0x25b9   :  { %v1768_v48 = vpop.permute.xlu0 %1767 }
0x25ba   :  { %v1770_v52 = vmul.f32 %v1768_v48, %v1753_v4 }
0x25bc   :  { %1772 = vrot.lane.b32.xlu1 %v1770_v52, %s2488_s6 }
0x262e   :  { %v1773_v43 = vpop.permute.xlu1 %1772 }
0x262f   :  { %2190 = vmatmul.mubr.msk.f32.vlgmr.msra.gmra.mrb[30].mxu0 %vm402_vm2, %v1773_v43 }
0x2630   :  { %2362 = vmatpush1.bf16.msra.mxu0 %v2938_v15  ;;  %2040 = vmatprep.mubr.f32.mxu0 %v2485_v3 }
0x2631   :  { %2364 = vmatprep.subr.bf16.mxu0 %v2940_v23 }
0x2634   :  { %2366 = vmatpush1.bf16.msra.mxu0 %v2951_v54 }
0x2702   :  { %v1842_v51 = vpop.f32.mrb[30].mxu0 }
0x2703   :  { %v1850_v46 = vadd.f32 %v1842_v51, %v2815_v27  ;;  %v1844_v62 = vpop.f32.mrb[31].mxu0 }
0x2704   :  { %v1847_v44 = vadd.f32 %v1844_v62, %v2811_v24 }
0x2705   :  { %2467 = vtanh.f32 %v1850_v46 }
0x2706   :  { %2469 = vtanh.f32 %v1847_v44 }
0x270f   :  { %v2468_v2 = vpop.eup %2467 }
0x2710   :  { %v2470_v5 = vpop.eup %2469  ;;  %v1852_v12 = vmul.f32 %v2468_v2, %v2584_v19 }
0x2711   :  { %v1849_v60 = vmax.f32 %v1749_v37, %v2470_v5  ;;  %v2377_v37 = vpack.c.bf16 %v2061_v36, %v2060_v6 }
0x2712   :  { %v1853_v15 = vadd.f32 %v1852_v12, %v2587_v20 }
0x2714   :  { %1856 = vrot.lane.b32.xlu0 %v1853_v15, %s2487_s3  ;;  %v1854_v54 = vmul.f32 %v1853_v15, %v1764_v0 }
0x2786   :  { %v1857_v23 = vpop.permute.xlu0 %1856 }
0x2787   :  { %v1859_v13 = vmul.f32 %v1857_v23, %v1853_v15 }
0x2789   :  { %1861 = vrot.lane.b32.xlu1 %v1859_v13, %s2487_s3 }
0x27fb   :  { %v1862_v27 = vpop.permute.xlu1 %1861 }
0x27fc   :  { %v1864_v59 = vadd.f32 %v1862_v27, %v1854_v54 }
0x27fe   :  { %2471 = vtanh.f32 %v1864_v59 }
0x2808   :  { %v2472_v24 = vpop.eup %2471 }
0x2809   :  { %1867 = vrot.lane.b32.xlu0 %v2472_v24, %s2487_s3 }
0x287b   :  { %v1868_v63 = vpop.permute.xlu0 %1867 }
0x287c   :  { %v1870_v56 = vmul.f32 %v1868_v63, %v1853_v15 }
0x287e   :  { %1872 = vrot.lane.b32.xlu1 %v1870_v56, %s2488_s6 }
0x28f0   :  { %v1873_v55 = vpop.permute.xlu1 %1872 }
0x28f1   :  { %2191 = vmatmul.mubr.msk.f32.vlgmr.msra.gmra.mrb[30].mxu1 %vm402_vm2, %v1873_v55 }
0x28f2   :  { %2220 = vmatprep.mubr.msk.f32.mxu1 %vm2490_vm3, %v2485_v3 }
0x29c4   :  { %v1942_v50 = vpop.f32.mrb[30].mxu1 }
0x29c5   :  { %v1950_v49 = vadd.f32 %v1942_v50, %v2823_v32  ;;  %v1944_v8 = vpop.f32.mrb[31].mxu1 }
0x29c6   :  { %v1947_v10 = vadd.f32 %v1944_v8, %v2819_v29 }
0x29c7   :  { %2473 = vtanh.f32 %v1950_v49 }
0x29c8   :  { %2475 = vtanh.f32 %v1947_v10 }
0x29d1   :  { %v2474_v11 = vpop.eup %2473 }
0x29d2   :  { %v2476_v1 = vpop.eup %2475  ;;  %v1952_v47 = vmul.f32 %v2474_v11, %v2584_v19 }
0x29d3   :  { %v1949_v17 = vmax.f32 %v1849_v60, %v2476_v1 }
0x29d4   :  { %v1953_v21 = vadd.f32 %v1952_v47, %v2587_v20  ;;  %v2489_v20 = vmov 0.0|0.0  }
0x29d5   :  { %2367 = vmatprep.subr.bf16.mxu1 %v2489_v20 }
0x29d6   :  { %1956 = vrot.lane.b32.xlu0 %v1953_v21, %s2487_s3  ;;  %v1954_v34 = vmul.f32 %v1953_v21, %v1864_v59  ;;  %2369 = vmatpush3.bf16.msra.mxu1 %v2368_v39 }
0x29d7   :  { %2370 = vmatprep.subr.bf16.mxu1 %v2489_v20 }
0x29da   :  { %2372 = vmatpush3.bf16.msra.mxu1 %v2371_v57 }
0x29db   :  { %2373 = vmatprep.subr.bf16.mxu1 %v2489_v20 }
0x29de   :  { %2375 = vmatpush3.bf16.msra.mxu1 %v2374_v33 }
0x29df   :  { %2376 = vmatprep.subr.bf16.mxu1 %v2489_v20 }
0x29e2   :  { %2378 = vmatpush3.bf16.msra.mxu1 %v2377_v37 }
0x2a48   :  { %v1957_v30 = vpop.permute.xlu0 %1956 }
0x2a49   :  { %v1959_v25 = vmul.f32 %v1957_v30, %v1953_v21 }
0x2a4b   :  { %1961 = vrot.lane.b32.xlu1 %v1959_v25, %s2487_s3 }
0x2abd   :  { %v1962_v32 = vpop.permute.xlu1 %1961 }
0x2abe   :  { %v1964_v7 = vadd.f32 %v1962_v32, %v1954_v34 }
0x2ac0   :  { %2477 = vtanh.f32 %v1964_v7 }
0x2aca   :  { %v2478_v29 = vpop.eup %2477 }
0x2acb   :  { %1967 = vrot.lane.b32.xlu0 %v2478_v29, %s2487_s3 }
0x2b3d   :  { %v1968_v16 = vpop.permute.xlu0 %1967 }
0x2b3e   :  { %v1970_v53 = vmul.f32 %v1968_v16, %v1953_v21 }
0x2b40   :  { %1972 = vrot.lane.b32.xlu1 %v1970_v53, %s2488_s6 }
0x2bb2   :  { %v1973_v19 = vpop.permute.xlu1 %1972 }
0x2bb3   :  { %2192 = vmatmul.mubr.msk.f32.vlgmr.msra.gmra.mrb[32].mxu0 %vm402_vm2, %v1973_v19 }
0x2c86   :  { %v2042_v4 = vpop.f32.mrb[32].mxu0 }
0x2c87   :  { %v2043_v41 = vpop.f32.mrb[33].mxu0 }
0x2c88   :  { %v2046_v45 = vadd.f32 %v2043_v41, %v2826_v35  ;;  %v2193_v35 = vld [vmem:[%s3125_s9] ss:$0 sm:$0xff] }
0x2c8a   :  { %2479 = vtanh.f32 %v2046_v45 }
0x2c94   :  { %v2480_v61 = vpop.eup %2479 }
0x2c95   :  { %v2048_v22 = vmax.f32 %v1949_v17, %v2480_v61 }
0x2c97   :  { %2050 = vrot.lane.b32.xlu0 %v2048_v22, %s2487_s3 }
0x2d09   :  { %v2051_v0 = vpop.permute.xlu0 %2050 }
0x2d0a   :  { %v2053_v18 = vsel %vm402_vm2, %v1180_v42, %v2051_v0 }
0x2d0b   :  { %2221 = vmatmul.mubr.msk.f32.vlgmr.msra.gmra.mrb[32].mxu1 %vm2069_vm4, %v2053_v18 }
0x2dde   :  { %v2139_v48 = vpop.f32.mrb[32].mxu1 }
0x2ddf   :  { %v2140_v52 = vadd.f32 %v2193_v35, %v2139_v48  ;;  %v2222_v3 = vpop.f32.mrb[33].mxu1 }
0x2de1   :  { %v2144_v43 = vsel %vm2143_vm5, %v2140_v52, -inf }
0x2de2   :  { %2145 = vmax.xlane.f32.xlu1 %v2144_v43 }
0x2e6f   :  { %v2146_v51 = vpop.xlane.xlu1 %2145 }
0x2e70   :  { %v2147_v46 = vsub.f32 %v2140_v52, %v2146_v51 }
0x2e72   :  { %v2148_v62 = vmul.f32 1.442695, %v2147_v46 }
0x2e74   :  { %2481 = vpow2.f32 %v2148_v62 }
0x2e7e   :  { %v2482_v44 = vpop.eup %2481 }
0x2e7f   :  { %v2150_v9 = vsel %vm2143_vm5, %v2482_v44, 0.0 }
0x2e80   :  { %2151 = vadd.xlane.f32.xlu0 %v2150_v9 }
0x2f0d   :  { %v2152_v40 = vpop.xlane.xlu0 %2151 }
0x2f0e   :  { %2483 = vrcp.f32 %v2152_v40 }
0x2f18   :  { %v2484_v42 = vpop.eup %2483 }
0x2f19   :  { %v2154_v2 = vmul.f32 %v2484_v42, %v2482_v44 }
0x2f1b   :  { %2155 = vst.msk [vmem:[%s3126_s10] sm:$0xff] %vm2143_vm5, %v2154_v2 }

</bundles_post_ra>
